<compile_context>
chip_gen: v7x
topology: tpu7x:2x2x1
jax: 0.10.0
libtpu: 0.0.40
codegen_flags: <defaults>
</compile_context>

<pallas_src>
import functools

import jax
import jax.numpy as jnp
from jax import lax
from jax.experimental import pallas as pl
from jax.experimental.pallas import tpu as pltpu

# ----- problem sizes (small, consistent with the module's forward) -----------
B = 2          # batch
FREQ = 8       # frequency tokens (context_info has Freq + 2 rows)
D = 32         # embedding dim
H = 4          # attention heads (embedding_dim // num_heads = head_dim)

_RMS_EPS = 1.1920929e-07   # torch nn.RMSNorm default eps=None -> finfo(float32).eps


def _rmsnorm(t, g):
    ms = jnp.mean(t * t, axis=-1, keepdims=True)
    return t * jax.lax.rsqrt(ms + _RMS_EPS) * g


def shared_layer_kernel(x_ref, qk_ref, fb_ref, dscale_ref, w_ref, vec_ref, out_ref,
                        *, batch, freq, num_heads, apply_drofe):
    """One SharedTransformerLayer forward for all (batch*freq) tokens, one grid step."""
    d = x_ref.shape[-1]
    dh = d // num_heads
    half = d // 2

    x = x_ref[...]            # (batch*freq, d)
    src = qk_ref[...]         # (batch*freq, d)  -- equals x unless `explanation` given

    # ---- packed weight slab (row blocks, all sublane-aligned multiples of 8) ----
    wq = w_ref[0 * d:1 * d, :]
    wk = w_ref[1 * d:2 * d, :]
    wv = w_ref[2 * d:3 * d, :]
    # wo rows (3d : 4d) are sliced per head below
    w1a = w_ref[4 * d:5 * d, :]       # GEGLU "gate" half of ff_linear1
    w1b = w_ref[5 * d:6 * d, :]       # GEGLU "linear" half of ff_linear1
    w2 = w_ref[6 * d:7 * d, :]

    # ---- packed bias / vector slab (one row each) ----
    bq = vec_ref[0:1, :]
    bk = vec_ref[1:2, :]
    bv = vec_ref[2:3, :]
    bo = vec_ref[3:4, :]
    b1a = vec_ref[4:5, :]
    b1b = vec_ref[5:6, :]
    b2 = vec_ref[6:7, :]
    g1 = vec_ref[7:8, :]
    g2 = vec_ref[8:9, :]

    # Projections over ALL tokens at once (one matmul each instead of per batch).
    q = jnp.dot(src, wq, preferred_element_type=jnp.float32) + bq
    k = jnp.dot(src, wk, preferred_element_type=jnp.float32) + bk
    v = jnp.dot(x, wv, preferred_element_type=jnp.float32) + bv

    if apply_drofe:
        # TODO(synk): dRoFEEmbedding source (model.dRoFE_embedding) is not provided;
        # stand-in: rotary rotation with angle = freq-band midpoint * inv_freq, plus
        # multiplicative (age, gender) scaling of the two rotated halves.
        inv_f = vec_ref[9:10, :]              # (1, d) inv-freq, duplicated across halves
        sgn = vec_ref[10:11, :]               # (1, d) = [-1]*half + [+1]*half
        fb = fb_ref[...]                      # (freq, 2) freq bounds (batch element 0)
        f_mid = 0.5 * (fb[:, 0:1] + fb[:, 1:2])          # (freq, 1)
        theta = f_mid * inv_f                             # (freq, d) broadcast mul (VPU)
        cos_f = jnp.cos(theta)
        sin_f = jnp.sin(theta) * sgn          # sign folds the rotate-half negation

    scale = 1.0 / jnp.sqrt(jnp.float32(dh))

    x1_parts = []
    for b in range(batch):                    # static: batch is tiny (2)
        lo = b * freq
        xb = x[lo:lo + freq, :]
        qb = q[lo:lo + freq, :]
        kb = k[lo:lo + freq, :]
        vb = v[lo:lo + freq, :]

        if apply_drofe:
            ds_b = dscale_ref[b:b + 1, :]     # (1, d) = [age]*half + [gender]*half
            qb = (qb * cos_f + pltpu.roll(qb, half, 1) * sin_f) * ds_b
            kb = (kb * cos_f + pltpu.roll(kb, half, 1) * sin_f) * ds_b

        # Multi-head attention: accumulate each head through its wo row block
        # (avoids a lane-axis concatenate of the head outputs).
        acc = jnp.zeros((freq, d), jnp.float32)
        for h in range(num_heads):            # static head loop
            s0 = h * dh
            hq = qb[:, s0:s0 + dh]
            hk = kb[:, s0:s0 + dh]
            hv = vb[:, s0:s0 + dh]
            sc = lax.dot_general(hq, hk, (((1,), (1,)), ((), ())),
                                 preferred_element_type=jnp.float32) * scale
            sc = sc - jnp.max(sc, axis=-1, keepdims=True)       # stable softmax
            p = jnp.exp(sc)
            p = p * pl.reciprocal(jnp.sum(p, axis=-1, keepdims=True), approx=True)
            pv = jnp.dot(p, hv, preferred_element_type=jnp.float32)
            wo_h = w_ref[3 * d + s0:3 * d + s0 + dh, :]
            acc = acc + jnp.dot(pv, wo_h, preferred_element_type=jnp.float32)
        attn_b = acc + bo                      # out_proj bias

        # residual + RMSNorm1 (dropout = identity in eval)
        x1_parts.append(_rmsnorm(xb + attn_b, g1))

    x1 = x1_parts[0] if batch == 1 else jnp.concatenate(x1_parts, axis=0)

    # ---- GEGLU feed-forward, batched over all tokens at once ----
    # Note: torch F.gelu default is exact (erf); tanh-approximate used here (EUP-cheap,
    # ~1e-3 max abs difference).
    gate = jax.nn.gelu(jnp.dot(x1, w1a, preferred_element_type=jnp.float32) + b1a,
                       approximate=True)
    lin = jnp.dot(x1, w1b, preferred_element_type=jnp.float32) + b1b
    ff = jnp.dot(gate * lin, w2, preferred_element_type=jnp.float32) + b2

    # residual + RMSNorm2
    out_ref[...] = _rmsnorm(x1 + ff, g2)


def init_params(key, d=D):
    """Synthetic weights (x @ W convention, i.e. transposed vs nn.Linear's (out,in))."""
    ks = jax.random.split(key, 9)

    def rnd(k, shape, s=0.05):
        return s * jax.random.normal(k, shape, dtype=jnp.float32)

    return dict(
        wq=rnd(ks[0], (d, d)), bq=rnd(ks[1], (d,), 0.01),
        wk=rnd(ks[2], (d, d)), bk=jnp.zeros((d,), jnp.float32),
        wv=rnd(ks[3], (d, d)), bv=jnp.zeros((d,), jnp.float32),
        wo=rnd(ks[4], (d, d)), bo=rnd(ks[5], (d,), 0.01),
        w1=rnd(ks[6], (d, 2 * d)), b1=jnp.zeros((2 * d,), jnp.float32),
        w2=rnd(ks[7], (d, d)), b2=rnd(ks[8], (d,), 0.01),
        g1=jnp.ones((d,), jnp.float32),      # RMSNorm1 weight
        g2=jnp.ones((d,), jnp.float32),      # RMSNorm2 weight
    )


def shared_transformer_layer_forward(params, x, context_info=None, explanation=None,
                                     num_heads=H):
    """Mirrors SharedTransformerLayer.forward: returns [B, Freq, d]."""
    Bx, Freq, d = x.shape
    half = d // 2

    x2d = x.reshape(Bx * Freq, d).astype(jnp.float32)
    qk_src = explanation if explanation is not None else x
    qk2d = qk_src.reshape(Bx * Freq, d).astype(jnp.float32)

    apply_drofe = context_info is not None
    if apply_drofe:
        # freq_bounds_single = context_info[0, :Freq, :2]  (matches the module)
        fb = context_info[0, :Freq, :2].astype(jnp.float32)                 # (Freq, 2)
        demo = context_info[:, Freq:Freq + 2, 0].astype(jnp.float32)        # (B, 2)
        age, gender = demo[:, 0:1], demo[:, 1:2]
        # per-batch demographic lane scale: first half lanes <- age, second <- gender
        dscale = jnp.concatenate([jnp.broadcast_to(age, (Bx, half)),
                                  jnp.broadcast_to(gender, (Bx, half))], axis=1)
    else:
        fb = jnp.zeros((Freq, 2), jnp.float32)
        dscale = jnp.ones((Bx, d), jnp.float32)

    # architectural constants for the dRoFE stand-in (duplicated across both halves)
    inv_freq_half = 1.0 / (100.0 ** (jnp.arange(half, dtype=jnp.float32) / half))
    inv_freq_full = jnp.concatenate([inv_freq_half, inv_freq_half])
    sign_full = jnp.concatenate([-jnp.ones((half,), jnp.float32),
                                 jnp.ones((half,), jnp.float32)])

    # ---- pack everything into two slabs (6 kernel inputs total) ----
    p = params
    w1a, w1b = p['w1'][:, :d], p['w1'][:, d:]
    b1a, b1b = p['b1'][:d], p['b1'][d:]
    w_slab = jnp.concatenate([p['wq'], p['wk'], p['wv'], p['wo'],
                              w1a, w1b, p['w2']], axis=0)                   # (7d, d)
    v_slab = jnp.stack([p['bq'], p['bk'], p['bv'], p['bo'],
                        b1a, b1b, p['b2'], p['g1'], p['g2'],
                        inv_freq_full, sign_full], axis=0)                  # (11, d)

    kernel = functools.partial(shared_layer_kernel, batch=Bx, freq=Freq,
                               num_heads=num_heads, apply_drofe=apply_drofe)

    inputs = (x2d, qk2d, fb, dscale, w_slab, v_slab)
    out2d = pl.pallas_call(
        kernel,
        out_shape=jax.ShapeDtypeStruct((Bx * Freq, d), jnp.float32),
        grid_spec=pltpu.PrefetchScalarGridSpec(
            num_scalar_prefetch=0,
            grid=(1,),                                   # single fused step
            in_specs=[pl.BlockSpec(a.shape, lambda i: (0, 0)) for a in inputs],
            out_specs=pl.BlockSpec((Bx * Freq, d), lambda i: (0, 0)),
        ),
        compiler_params=pltpu.CompilerParams(dimension_semantics=("arbitrary",)),
    )(*inputs)

    return out2d.reshape(Bx, Freq, d)


if __name__ == "__main__":
    key = jax.random.PRNGKey(0)
    kx, kc, kp = jax.random.split(key, 3)

    x = jax.random.normal(kx, (B, FREQ, D), dtype=jnp.float32)             # [B, Freq, d]
    context_info = jax.random.normal(kc, (B, FREQ + 2, 2), jnp.float32)    # [B, Freq+2, 2]
    params = init_params(kp)

    out = shared_transformer_layer_forward(params, x, context_info)
    jax.block_until_ready(out)
    assert out.shape == (B, FREQ, D), out.shape
    assert bool(jnp.all(jnp.isfinite(out)))
    print("KERNEL_OK")
</pallas_src>

<mosaic_0001>
module attributes {stable_mosaic.version = 11 : i64} {
  func.func @shared_layer_kernel(%arg0: i32, %arg1: memref<16x32xf32, #tpu.memory_space<vmem>>, %arg2: memref<16x32xf32, #tpu.memory_space<vmem>>, %arg3: memref<8x2xf32, #tpu.memory_space<vmem>>, %arg4: memref<2x32xf32, #tpu.memory_space<vmem>>, %arg5: memref<224x32xf32, #tpu.memory_space<vmem>>, %arg6: memref<11x32xf32, #tpu.memory_space<vmem>>, %arg7: memref<16x32xf32, #tpu.memory_space<vmem>>) attributes {dimension_semantics = [#tpu.dimension_semantics<arbitrary>], iteration_bounds = array<i64: 1>, scalar_prefetch = 0 : i64, scratch_operands = 0 : i64, tpu.core_type = #tpu.core_type<tc>, window_params = [{pipeline_mode = #tpu.pipeline_mode<synchronous>, transform_indices = @transform_0, window_bounds = array<i64: 16, 32>}, {pipeline_mode = #tpu.pipeline_mode<synchronous>, transform_indices = @transform_1, window_bounds = array<i64: 16, 32>}, {pipeline_mode = #tpu.pipeline_mode<synchronous>, transform_indices = @transform_2, window_bounds = array<i64: 8, 2>}, {pipeline_mode = #tpu.pipeline_mode<synchronous>, transform_indices = @transform_3, window_bounds = array<i64: 2, 32>}, {pipeline_mode = #tpu.pipeline_mode<synchronous>, transform_indices = @transform_4, window_bounds = array<i64: 224, 32>}, {pipeline_mode = #tpu.pipeline_mode<synchronous>, transform_indices = @transform_5, window_bounds = array<i64: 11, 32>}, {pipeline_mode = #tpu.pipeline_mode<synchronous>, transform_indices = @transform_6, window_bounds = array<i64: 16, 32>}]} {
    %c0 = arith.constant 0 : index
    %c0_0 = arith.constant 0 : index
    %0 = vector.load %arg1[%c0, %c0_0] : memref<16x32xf32, #tpu.memory_space<vmem>>, vector<16x32xf32>
    %c0_1 = arith.constant 0 : index
    %c0_2 = arith.constant 0 : index
    %1 = vector.load %arg2[%c0_1, %c0_2] : memref<16x32xf32, #tpu.memory_space<vmem>>, vector<16x32xf32>
    %c0_3 = arith.constant 0 : index
    %c0_4 = arith.constant 0 : index
    %2 = vector.load %arg5[%c0_3, %c0_4] : memref<224x32xf32, #tpu.memory_space<vmem>>, vector<32x32xf32>
    %c32 = arith.constant 32 : index
    %c0_5 = arith.constant 0 : index
    %3 = vector.load %arg5[%c32, %c0_5] : memref<224x32xf32, #tpu.memory_space<vmem>>, vector<32x32xf32>
    %c64 = arith.constant 64 : index
    %c0_6 = arith.constant 0 : index
    %4 = vector.load %arg5[%c64, %c0_6] : memref<224x32xf32, #tpu.memory_space<vmem>>, vector<32x32xf32>
    %c128 = arith.constant 128 : index
    %c0_7 = arith.constant 0 : index
    %5 = vector.load %arg5[%c128, %c0_7] : memref<224x32xf32, #tpu.memory_space<vmem>>, vector<32x32xf32>
    %c160 = arith.constant 160 : index
    %c0_8 = arith.constant 0 : index
    %6 = vector.load %arg5[%c160, %c0_8] : memref<224x32xf32, #tpu.memory_space<vmem>>, vector<32x32xf32>
    %c192 = arith.constant 192 : index
    %c0_9 = arith.constant 0 : index
    %7 = vector.load %arg5[%c192, %c0_9] : memref<224x32xf32, #tpu.memory_space<vmem>>, vector<32x32xf32>
    %c0_10 = arith.constant 0 : index
    %c0_11 = arith.constant 0 : index
    %8 = vector.load %arg6[%c0_10, %c0_11] : memref<11x32xf32, #tpu.memory_space<vmem>>, vector<1x32xf32>
    %c1 = arith.constant 1 : index
    %c0_12 = arith.constant 0 : index
    %9 = vector.load %arg6[%c1, %c0_12] : memref<11x32xf32, #tpu.memory_space<vmem>>, vector<1x32xf32>
    %c2 = arith.constant 2 : index
    %c0_13 = arith.constant 0 : index
    %10 = vector.load %arg6[%c2, %c0_13] : memref<11x32xf32, #tpu.memory_space<vmem>>, vector<1x32xf32>
    %c3 = arith.constant 3 : index
    %c0_14 = arith.constant 0 : index
    %11 = vector.load %arg6[%c3, %c0_14] : memref<11x32xf32, #tpu.memory_space<vmem>>, vector<1x32xf32>
    %c4 = arith.constant 4 : index
    %c0_15 = arith.constant 0 : index
    %12 = vector.load %arg6[%c4, %c0_15] : memref<11x32xf32, #tpu.memory_space<vmem>>, vector<1x32xf32>
    %c5 = arith.constant 5 : index
    %c0_16 = arith.constant 0 : index
    %13 = vector.load %arg6[%c5, %c0_16] : memref<11x32xf32, #tpu.memory_space<vmem>>, vector<1x32xf32>
    %c6 = arith.constant 6 : index
    %c0_17 = arith.constant 0 : index
    %14 = vector.load %arg6[%c6, %c0_17] : memref<11x32xf32, #tpu.memory_space<vmem>>, vector<1x32xf32>
    %c7 = arith.constant 7 : index
    %c0_18 = arith.constant 0 : index
    %15 = vector.load %arg6[%c7, %c0_18] : memref<11x32xf32, #tpu.memory_space<vmem>>, vector<1x32xf32>
    %c8 = arith.constant 8 : index
    %c0_19 = arith.constant 0 : index
    %16 = vector.load %arg6[%c8, %c0_19] : memref<11x32xf32, #tpu.memory_space<vmem>>, vector<1x32xf32>
    %cst = arith.constant dense<0.000000e+00> : vector<16x32xf32>
    %17 = tpu.matmul %1, %2, %cst {dimension_numbers = #tpu.dot_dimension_numbers<[1], [0], [0], [1], [0, 0, 1, 1], [], []>} : vector<16x32xf32>, vector<32x32xf32>, vector<16x32xf32> -> vector<16x32xf32>
    %18 = vector.broadcast %8 : vector<1x32xf32> to vector<16x32xf32>
    %19 = arith.addf %17, %18 : vector<16x32xf32>
    %cst_20 = arith.constant dense<0.000000e+00> : vector<16x32xf32>
    %20 = tpu.matmul %1, %3, %cst_20 {dimension_numbers = #tpu.dot_dimension_numbers<[1], [0], [0], [1], [0, 0, 1, 1], [], []>} : vector<16x32xf32>, vector<32x32xf32>, vector<16x32xf32> -> vector<16x32xf32>
    %21 = vector.broadcast %9 : vector<1x32xf32> to vector<16x32xf32>
    %22 = arith.addf %20, %21 : vector<16x32xf32>
    %cst_21 = arith.constant dense<0.000000e+00> : vector<16x32xf32>
    %23 = tpu.matmul %0, %4, %cst_21 {dimension_numbers = #tpu.dot_dimension_numbers<[1], [0], [0], [1], [0, 0, 1, 1], [], []>} : vector<16x32xf32>, vector<32x32xf32>, vector<16x32xf32> -> vector<16x32xf32>
    %24 = vector.broadcast %10 : vector<1x32xf32> to vector<16x32xf32>
    %25 = arith.addf %23, %24 : vector<16x32xf32>
    %c9 = arith.constant 9 : index
    %c0_22 = arith.constant 0 : index
    %26 = vector.load %arg6[%c9, %c0_22] : memref<11x32xf32, #tpu.memory_space<vmem>>, vector<1x32xf32>
    %c10 = arith.constant 10 : index
    %c0_23 = arith.constant 0 : index
    %27 = vector.load %arg6[%c10, %c0_23] : memref<11x32xf32, #tpu.memory_space<vmem>>, vector<1x32xf32>
    %c0_24 = arith.constant 0 : index
    %c0_25 = arith.constant 0 : index
    %28 = vector.load %arg3[%c0_24, %c0_25] : memref<8x2xf32, #tpu.memory_space<vmem>>, vector<8x2xf32>
    %29 = vector.extract_strided_slice %28 {offsets = [0, 0], sizes = [8, 1], strides = [1, 1]} : vector<8x2xf32> to vector<8x1xf32>
    %30 = vector.extract_strided_slice %28 {offsets = [0, 1], sizes = [8, 1], strides = [1, 1]} : vector<8x2xf32> to vector<8x1xf32>
    %31 = arith.addf %29, %30 : vector<8x1xf32>
    %cst_26 = arith.constant 5.000000e-01 : f32
    %32 = vector.broadcast %cst_26 : f32 to vector<8x1xf32>
    %33 = arith.mulf %32, %31 : vector<8x1xf32>
    %34 = vector.broadcast %33 : vector<8x1xf32> to vector<8x32xf32>
    %35 = vector.broadcast %26 : vector<1x32xf32> to vector<8x32xf32>
    %36 = arith.mulf %34, %35 : vector<8x32xf32>
    %37 = math.cos %36 : vector<8x32xf32>
    %38 = math.sin %36 : vector<8x32xf32>
    %39 = vector.broadcast %27 : vector<1x32xf32> to vector<8x32xf32>
    %40 = arith.mulf %38, %39 : vector<8x32xf32>
    %cst_27 = arith.constant 8.000000e+00 : f32
    %41 = math.sqrt %cst_27 : f32
    %cst_28 = arith.constant 1.000000e+00 : f32
    %42 = arith.divf %cst_28, %41 : f32
    %43 = vector.extract_strided_slice %0 {offsets = [0, 0], sizes = [8, 32], strides = [1, 1]} : vector<16x32xf32> to vector<8x32xf32>
    %44 = vector.extract_strided_slice %19 {offsets = [0, 0], sizes = [8, 32], strides = [1, 1]} : vector<16x32xf32> to vector<8x32xf32>
    %45 = vector.extract_strided_slice %22 {offsets = [0, 0], sizes = [8, 32], strides = [1, 1]} : vector<16x32xf32> to vector<8x32xf32>
    %46 = vector.extract_strided_slice %25 {offsets = [0, 0], sizes = [8, 32], strides = [1, 1]} : vector<16x32xf32> to vector<8x32xf32>
    %c0_29 = arith.constant 0 : index
    %c0_30 = arith.constant 0 : index
    %47 = vector.load %arg4[%c0_29, %c0_30] : memref<2x32xf32, #tpu.memory_space<vmem>>, vector<1x32xf32>
    %48 = arith.mulf %44, %37 : vector<8x32xf32>
    %c16_i32 = arith.constant 16 : i32
    %49 = tpu.dynamic_rotate %44 by %c16_i32 dim 1 : vector<8x32xf32>, i32 -> vector<8x32xf32>
    %50 = arith.mulf %49, %40 : vector<8x32xf32>
    %51 = arith.addf %48, %50 : vector<8x32xf32>
    %52 = vector.broadcast %47 : vector<1x32xf32> to vector<8x32xf32>
    %53 = arith.mulf %51, %52 : vector<8x32xf32>
    %54 = arith.mulf %45, %37 : vector<8x32xf32>
    %c16_i32_31 = arith.constant 16 : i32
    %55 = tpu.dynamic_rotate %45 by %c16_i32_31 dim 1 : vector<8x32xf32>, i32 -> vector<8x32xf32>
    %56 = arith.mulf %55, %40 : vector<8x32xf32>
    %57 = arith.addf %54, %56 : vector<8x32xf32>
    %58 = vector.broadcast %47 : vector<1x32xf32> to vector<8x32xf32>
    %59 = arith.mulf %57, %58 : vector<8x32xf32>
    %cst_32 = arith.constant 0.000000e+00 : f32
    %60 = vector.broadcast %cst_32 : f32 to vector<8x32xf32>
    %61 = vector.extract_strided_slice %53 {offsets = [0, 0], sizes = [8, 8], strides = [1, 1]} : vector<8x32xf32> to vector<8x8xf32>
    %62 = vector.extract_strided_slice %59 {offsets = [0, 0], sizes = [8, 8], strides = [1, 1]} : vector<8x32xf32> to vector<8x8xf32>
    %63 = vector.extract_strided_slice %46 {offsets = [0, 0], sizes = [8, 8], strides = [1, 1]} : vector<8x32xf32> to vector<8x8xf32>
    %cst_33 = arith.constant dense<0.000000e+00> : vector<8x8xf32>
    %64 = tpu.matmul %61, %62, %cst_33 {dimension_numbers = #tpu.dot_dimension_numbers<[1], [1], [0], [0], [0, 0, 1, 0], [], []>} : vector<8x8xf32>, vector<8x8xf32>, vector<8x8xf32> -> vector<8x8xf32>
    %65 = vector.broadcast %42 : f32 to vector<8x8xf32>
    %66 = arith.mulf %64, %65 : vector<8x8xf32>
    %cst_34 = arith.constant dense<0xFF800000> : vector<8xf32>
    %67 = vector.multi_reduction <maximumf>, %66, %cst_34 [1] : vector<8x8xf32> to vector<8xf32>
    %68 = vector.shape_cast %67 : vector<8xf32> to vector<8x1xf32>
    %69 = vector.broadcast %68 : vector<8x1xf32> to vector<8x8xf32>
    %70 = arith.subf %66, %69 : vector<8x8xf32>
    %71 = math.exp %70 : vector<8x8xf32>
    %cst_35 = arith.constant dense<0.000000e+00> : vector<8xf32>
    %72 = vector.multi_reduction <add>, %71, %cst_35 [1] : vector<8x8xf32> to vector<8xf32>
    %73 = vector.shape_cast %72 : vector<8xf32> to vector<8x1xf32>
    %74 = tpu.reciprocal %73 {approx = true} : vector<8x1xf32> -> vector<8x1xf32>
    %75 = vector.broadcast %74 : vector<8x1xf32> to vector<8x8xf32>
    %76 = arith.mulf %71, %75 : vector<8x8xf32>
    %cst_36 = arith.constant dense<0.000000e+00> : vector<8x8xf32>
    %77 = tpu.matmul %76, %63, %cst_36 {dimension_numbers = #tpu.dot_dimension_numbers<[1], [0], [0], [1], [0, 0, 1, 1], [], []>} : vector<8x8xf32>, vector<8x8xf32>, vector<8x8xf32> -> vector<8x8xf32>
    %c96 = arith.constant 96 : index
    %c0_37 = arith.constant 0 : index
    %78 = vector.load %arg5[%c96, %c0_37] : memref<224x32xf32, #tpu.memory_space<vmem>>, vector<8x32xf32>
    %cst_38 = arith.constant dense<0.000000e+00> : vector<8x32xf32>
    %79 = tpu.matmul %77, %78, %cst_38 {dimension_numbers = #tpu.dot_dimension_numbers<[1], [0], [0], [1], [0, 0, 1, 1], [], []>} : vector<8x8xf32>, vector<8x32xf32>, vector<8x32xf32> -> vector<8x32xf32>
    %80 = arith.addf %60, %79 : vector<8x32xf32>
    %81 = vector.extract_strided_slice %53 {offsets = [0, 8], sizes = [8, 8], strides = [1, 1]} : vector<8x32xf32> to vector<8x8xf32>
    %82 = vector.extract_strided_slice %59 {offsets = [0, 8], sizes = [8, 8], strides = [1, 1]} : vector<8x32xf32> to vector<8x8xf32>
    %83 = vector.extract_strided_slice %46 {offsets = [0, 8], sizes = [8, 8], strides = [1, 1]} : vector<8x32xf32> to vector<8x8xf32>
    %cst_39 = arith.constant dense<0.000000e+00> : vector<8x8xf32>
    %84 = tpu.matmul %81, %82, %cst_39 {dimension_numbers = #tpu.dot_dimension_numbers<[1], [1], [0], [0], [0, 0, 1, 0], [], []>} : vector<8x8xf32>, vector<8x8xf32>, vector<8x8xf32> -> vector<8x8xf32>
    %85 = vector.broadcast %42 : f32 to vector<8x8xf32>
    %86 = arith.mulf %84, %85 : vector<8x8xf32>
    %cst_40 = arith.constant dense<0xFF800000> : vector<8xf32>
    %87 = vector.multi_reduction <maximumf>, %86, %cst_40 [1] : vector<8x8xf32> to vector<8xf32>
    %88 = vector.shape_cast %87 : vector<8xf32> to vector<8x1xf32>
    %89 = vector.broadcast %88 : vector<8x1xf32> to vector<8x8xf32>
    %90 = arith.subf %86, %89 : vector<8x8xf32>
    %91 = math.exp %90 : vector<8x8xf32>
    %cst_41 = arith.constant dense<0.000000e+00> : vector<8xf32>
    %92 = vector.multi_reduction <add>, %91, %cst_41 [1] : vector<8x8xf32> to vector<8xf32>
    %93 = vector.shape_cast %92 : vector<8xf32> to vector<8x1xf32>
    %94 = tpu.reciprocal %93 {approx = true} : vector<8x1xf32> -> vector<8x1xf32>
    %95 = vector.broadcast %94 : vector<8x1xf32> to vector<8x8xf32>
    %96 = arith.mulf %91, %95 : vector<8x8xf32>
    %cst_42 = arith.constant dense<0.000000e+00> : vector<8x8xf32>
    %97 = tpu.matmul %96, %83, %cst_42 {dimension_numbers = #tpu.dot_dimension_numbers<[1], [0], [0], [1], [0, 0, 1, 1], [], []>} : vector<8x8xf32>, vector<8x8xf32>, vector<8x8xf32> -> vector<8x8xf32>
    %c104 = arith.constant 104 : index
    %c0_43 = arith.constant 0 : index
    %98 = vector.load %arg5[%c104, %c0_43] : memref<224x32xf32, #tpu.memory_space<vmem>>, vector<8x32xf32>
    %cst_44 = arith.constant dense<0.000000e+00> : vector<8x32xf32>
    %99 = tpu.matmul %97, %98, %cst_44 {dimension_numbers = #tpu.dot_dimension_numbers<[1], [0], [0], [1], [0, 0, 1, 1], [], []>} : vector<8x8xf32>, vector<8x32xf32>, vector<8x32xf32> -> vector<8x32xf32>
    %100 = arith.addf %80, %99 : vector<8x32xf32>
    %101 = vector.extract_strided_slice %53 {offsets = [0, 16], sizes = [8, 8], strides = [1, 1]} : vector<8x32xf32> to vector<8x8xf32>
    %102 = vector.extract_strided_slice %59 {offsets = [0, 16], sizes = [8, 8], strides = [1, 1]} : vector<8x32xf32> to vector<8x8xf32>
    %103 = vector.extract_strided_slice %46 {offsets = [0, 16], sizes = [8, 8], strides = [1, 1]} : vector<8x32xf32> to vector<8x8xf32>
    %cst_45 = arith.constant dense<0.000000e+00> : vector<8x8xf32>
    %104 = tpu.matmul %101, %102, %cst_45 {dimension_numbers = #tpu.dot_dimension_numbers<[1], [1], [0], [0], [0, 0, 1, 0], [], []>} : vector<8x8xf32>, vector<8x8xf32>, vector<8x8xf32> -> vector<8x8xf32>
    %105 = vector.broadcast %42 : f32 to vector<8x8xf32>
    %106 = arith.mulf %104, %105 : vector<8x8xf32>
    %cst_46 = arith.constant dense<0xFF800000> : vector<8xf32>
    %107 = vector.multi_reduction <maximumf>, %106, %cst_46 [1] : vector<8x8xf32> to vector<8xf32>
    %108 = vector.shape_cast %107 : vector<8xf32> to vector<8x1xf32>
    %109 = vector.broadcast %108 : vector<8x1xf32> to vector<8x8xf32>
    %110 = arith.subf %106, %109 : vector<8x8xf32>
    %111 = math.exp %110 : vector<8x8xf32>
    %cst_47 = arith.constant dense<0.000000e+00> : vector<8xf32>
    %112 = vector.multi_reduction <add>, %111, %cst_47 [1] : vector<8x8xf32> to vector<8xf32>
    %113 = vector.shape_cast %112 : vector<8xf32> to vector<8x1xf32>
    %114 = tpu.reciprocal %113 {approx = true} : vector<8x1xf32> -> vector<8x1xf32>
    %115 = vector.broadcast %114 : vector<8x1xf32> to vector<8x8xf32>
    %116 = arith.mulf %111, %115 : vector<8x8xf32>
    %cst_48 = arith.constant dense<0.000000e+00> : vector<8x8xf32>
    %117 = tpu.matmul %116, %103, %cst_48 {dimension_numbers = #tpu.dot_dimension_numbers<[1], [0], [0], [1], [0, 0, 1, 1], [], []>} : vector<8x8xf32>, vector<8x8xf32>, vector<8x8xf32> -> vector<8x8xf32>
    %c112 = arith.constant 112 : index
    %c0_49 = arith.constant 0 : index
    %118 = vector.load %arg5[%c112, %c0_49] : memref<224x32xf32, #tpu.memory_space<vmem>>, vector<8x32xf32>
    %cst_50 = arith.constant dense<0.000000e+00> : vector<8x32xf32>
    %119 = tpu.matmul %117, %118, %cst_50 {dimension_numbers = #tpu.dot_dimension_numbers<[1], [0], [0], [1], [0, 0, 1, 1], [], []>} : vector<8x8xf32>, vector<8x32xf32>, vector<8x32xf32> -> vector<8x32xf32>
    %120 = arith.addf %100, %119 : vector<8x32xf32>
    %121 = vector.extract_strided_slice %53 {offsets = [0, 24], sizes = [8, 8], strides = [1, 1]} : vector<8x32xf32> to vector<8x8xf32>
    %122 = vector.extract_strided_slice %59 {offsets = [0, 24], sizes = [8, 8], strides = [1, 1]} : vector<8x32xf32> to vector<8x8xf32>
    %123 = vector.extract_strided_slice %46 {offsets = [0, 24], sizes = [8, 8], strides = [1, 1]} : vector<8x32xf32> to vector<8x8xf32>
    %cst_51 = arith.constant dense<0.000000e+00> : vector<8x8xf32>
    %124 = tpu.matmul %121, %122, %cst_51 {dimension_numbers = #tpu.dot_dimension_numbers<[1], [1], [0], [0], [0, 0, 1, 0], [], []>} : vector<8x8xf32>, vector<8x8xf32>, vector<8x8xf32> -> vector<8x8xf32>
    %125 = vector.broadcast %42 : f32 to vector<8x8xf32>
    %126 = arith.mulf %124, %125 : vector<8x8xf32>
    %cst_52 = arith.constant dense<0xFF800000> : vector<8xf32>
    %127 = vector.multi_reduction <maximumf>, %126, %cst_52 [1] : vector<8x8xf32> to vector<8xf32>
    %128 = vector.shape_cast %127 : vector<8xf32> to vector<8x1xf32>
    %129 = vector.broadcast %128 : vector<8x1xf32> to vector<8x8xf32>
    %130 = arith.subf %126, %129 : vector<8x8xf32>
    %131 = math.exp %130 : vector<8x8xf32>
    %cst_53 = arith.constant dense<0.000000e+00> : vector<8xf32>
    %132 = vector.multi_reduction <add>, %131, %cst_53 [1] : vector<8x8xf32> to vector<8xf32>
    %133 = vector.shape_cast %132 : vector<8xf32> to vector<8x1xf32>
    %134 = tpu.reciprocal %133 {approx = true} : vector<8x1xf32> -> vector<8x1xf32>
    %135 = vector.broadcast %134 : vector<8x1xf32> to vector<8x8xf32>
    %136 = arith.mulf %131, %135 : vector<8x8xf32>
    %cst_54 = arith.constant dense<0.000000e+00> : vector<8x8xf32>
    %137 = tpu.matmul %136, %123, %cst_54 {dimension_numbers = #tpu.dot_dimension_numbers<[1], [0], [0], [1], [0, 0, 1, 1], [], []>} : vector<8x8xf32>, vector<8x8xf32>, vector<8x8xf32> -> vector<8x8xf32>
    %c120 = arith.constant 120 : index
    %c0_55 = arith.constant 0 : index
    %138 = vector.load %arg5[%c120, %c0_55] : memref<224x32xf32, #tpu.memory_space<vmem>>, vector<8x32xf32>
    %cst_56 = arith.constant dense<0.000000e+00> : vector<8x32xf32>
    %139 = tpu.matmul %137, %138, %cst_56 {dimension_numbers = #tpu.dot_dimension_numbers<[1], [0], [0], [1], [0, 0, 1, 1], [], []>} : vector<8x8xf32>, vector<8x32xf32>, vector<8x32xf32> -> vector<8x32xf32>
    %140 = arith.addf %120, %139 : vector<8x32xf32>
    %141 = vector.broadcast %11 : vector<1x32xf32> to vector<8x32xf32>
    %142 = arith.addf %140, %141 : vector<8x32xf32>
    %143 = arith.addf %43, %142 : vector<8x32xf32>
    %144 = arith.mulf %143, %143 : vector<8x32xf32>
    %cst_57 = arith.constant dense<0.000000e+00> : vector<8xf32>
    %145 = vector.multi_reduction <add>, %144, %cst_57 [1] : vector<8x32xf32> to vector<8xf32>
    %146 = vector.shape_cast %145 : vector<8xf32> to vector<8x1xf32>
    %cst_58 = arith.constant 3.200000e+01 : f32
    %147 = vector.broadcast %cst_58 : f32 to vector<8x1xf32>
    %148 = arith.divf %146, %147 : vector<8x1xf32>
    %cst_59 = arith.constant 1.1920929E-7 : f32
    %149 = vector.broadcast %cst_59 : f32 to vector<8x1xf32>
    %150 = arith.addf %148, %149 : vector<8x1xf32>
    %151 = math.rsqrt %150 : vector<8x1xf32>
    %152 = vector.broadcast %151 : vector<8x1xf32> to vector<8x32xf32>
    %153 = arith.mulf %143, %152 : vector<8x32xf32>
    %154 = vector.broadcast %15 : vector<1x32xf32> to vector<8x32xf32>
    %155 = arith.mulf %153, %154 : vector<8x32xf32>
    %156 = vector.extract_strided_slice %0 {offsets = [8, 0], sizes = [8, 32], strides = [1, 1]} : vector<16x32xf32> to vector<8x32xf32>
    %157 = vector.extract_strided_slice %19 {offsets = [8, 0], sizes = [8, 32], strides = [1, 1]} : vector<16x32xf32> to vector<8x32xf32>
    %158 = vector.extract_strided_slice %22 {offsets = [8, 0], sizes = [8, 32], strides = [1, 1]} : vector<16x32xf32> to vector<8x32xf32>
    %159 = vector.extract_strided_slice %25 {offsets = [8, 0], sizes = [8, 32], strides = [1, 1]} : vector<16x32xf32> to vector<8x32xf32>
    %c1_60 = arith.constant 1 : index
    %c0_61 = arith.constant 0 : index
    %160 = vector.load %arg4[%c1_60, %c0_61] : memref<2x32xf32, #tpu.memory_space<vmem>>, vector<1x32xf32>
    %161 = arith.mulf %157, %37 : vector<8x32xf32>
    %c16_i32_62 = arith.constant 16 : i32
    %162 = tpu.dynamic_rotate %157 by %c16_i32_62 dim 1 : vector<8x32xf32>, i32 -> vector<8x32xf32>
    %163 = arith.mulf %162, %40 : vector<8x32xf32>
    %164 = arith.addf %161, %163 : vector<8x32xf32>
    %165 = vector.broadcast %160 : vector<1x32xf32> to vector<8x32xf32>
    %166 = arith.mulf %164, %165 : vector<8x32xf32>
    %167 = arith.mulf %158, %37 : vector<8x32xf32>
    %c16_i32_63 = arith.constant 16 : i32
    %168 = tpu.dynamic_rotate %158 by %c16_i32_63 dim 1 : vector<8x32xf32>, i32 -> vector<8x32xf32>
    %169 = arith.mulf %168, %40 : vector<8x32xf32>
    %170 = arith.addf %167, %169 : vector<8x32xf32>
    %171 = vector.broadcast %160 : vector<1x32xf32> to vector<8x32xf32>
    %172 = arith.mulf %170, %171 : vector<8x32xf32>
    %cst_64 = arith.constant 0.000000e+00 : f32
    %173 = vector.broadcast %cst_64 : f32 to vector<8x32xf32>
    %174 = vector.extract_strided_slice %166 {offsets = [0, 0], sizes = [8, 8], strides = [1, 1]} : vector<8x32xf32> to vector<8x8xf32>
    %175 = vector.extract_strided_slice %172 {offsets = [0, 0], sizes = [8, 8], strides = [1, 1]} : vector<8x32xf32> to vector<8x8xf32>
    %176 = vector.extract_strided_slice %159 {offsets = [0, 0], sizes = [8, 8], strides = [1, 1]} : vector<8x32xf32> to vector<8x8xf32>
    %cst_65 = arith.constant dense<0.000000e+00> : vector<8x8xf32>
    %177 = tpu.matmul %174, %175, %cst_65 {dimension_numbers = #tpu.dot_dimension_numbers<[1], [1], [0], [0], [0, 0, 1, 0], [], []>} : vector<8x8xf32>, vector<8x8xf32>, vector<8x8xf32> -> vector<8x8xf32>
    %178 = vector.broadcast %42 : f32 to vector<8x8xf32>
    %179 = arith.mulf %177, %178 : vector<8x8xf32>
    %cst_66 = arith.constant dense<0xFF800000> : vector<8xf32>
    %180 = vector.multi_reduction <maximumf>, %179, %cst_66 [1] : vector<8x8xf32> to vector<8xf32>
    %181 = vector.shape_cast %180 : vector<8xf32> to vector<8x1xf32>
    %182 = vector.broadcast %181 : vector<8x1xf32> to vector<8x8xf32>
    %183 = arith.subf %179, %182 : vector<8x8xf32>
    %184 = math.exp %183 : vector<8x8xf32>
    %cst_67 = arith.constant dense<0.000000e+00> : vector<8xf32>
    %185 = vector.multi_reduction <add>, %184, %cst_67 [1] : vector<8x8xf32> to vector<8xf32>
    %186 = vector.shape_cast %185 : vector<8xf32> to vector<8x1xf32>
    %187 = tpu.reciprocal %186 {approx = true} : vector<8x1xf32> -> vector<8x1xf32>
    %188 = vector.broadcast %187 : vector<8x1xf32> to vector<8x8xf32>
    %189 = arith.mulf %184, %188 : vector<8x8xf32>
    %cst_68 = arith.constant dense<0.000000e+00> : vector<8x8xf32>
    %190 = tpu.matmul %189, %176, %cst_68 {dimension_numbers = #tpu.dot_dimension_numbers<[1], [0], [0], [1], [0, 0, 1, 1], [], []>} : vector<8x8xf32>, vector<8x8xf32>, vector<8x8xf32> -> vector<8x8xf32>
    %c96_69 = arith.constant 96 : index
    %c0_70 = arith.constant 0 : index
    %191 = vector.load %arg5[%c96_69, %c0_70] : memref<224x32xf32, #tpu.memory_space<vmem>>, vector<8x32xf32>
    %cst_71 = arith.constant dense<0.000000e+00> : vector<8x32xf32>
    %192 = tpu.matmul %190, %191, %cst_71 {dimension_numbers = #tpu.dot_dimension_numbers<[1], [0], [0], [1], [0, 0, 1, 1], [], []>} : vector<8x8xf32>, vector<8x32xf32>, vector<8x32xf32> -> vector<8x32xf32>
    %193 = arith.addf %173, %192 : vector<8x32xf32>
    %194 = vector.extract_strided_slice %166 {offsets = [0, 8], sizes = [8, 8], strides = [1, 1]} : vector<8x32xf32> to vector<8x8xf32>
    %195 = vector.extract_strided_slice %172 {offsets = [0, 8], sizes = [8, 8], strides = [1, 1]} : vector<8x32xf32> to vector<8x8xf32>
    %196 = vector.extract_strided_slice %159 {offsets = [0, 8], sizes = [8, 8], strides = [1, 1]} : vector<8x32xf32> to vector<8x8xf32>
    %cst_72 = arith.constant dense<0.000000e+00> : vector<8x8xf32>
    %197 = tpu.matmul %194, %195, %cst_72 {dimension_numbers = #tpu.dot_dimension_numbers<[1], [1], [0], [0], [0, 0, 1, 0], [], []>} : vector<8x8xf32>, vector<8x8xf32>, vector<8x8xf32> -> vector<8x8xf32>
    %198 = vector.broadcast %42 : f32 to vector<8x8xf32>
    %199 = arith.mulf %197, %198 : vector<8x8xf32>
    %cst_73 = arith.constant dense<0xFF800000> : vector<8xf32>
    %200 = vector.multi_reduction <maximumf>, %199, %cst_73 [1] : vector<8x8xf32> to vector<8xf32>
    %201 = vector.shape_cast %200 : vector<8xf32> to vector<8x1xf32>
    %202 = vector.broadcast %201 : vector<8x1xf32> to vector<8x8xf32>
    %203 = arith.subf %199, %202 : vector<8x8xf32>
    %204 = math.exp %203 : vector<8x8xf32>
    %cst_74 = arith.constant dense<0.000000e+00> : vector<8xf32>
    %205 = vector.multi_reduction <add>, %204, %cst_74 [1] : vector<8x8xf32> to vector<8xf32>
    %206 = vector.shape_cast %205 : vector<8xf32> to vector<8x1xf32>
    %207 = tpu.reciprocal %206 {approx = true} : vector<8x1xf32> -> vector<8x1xf32>
    %208 = vector.broadcast %207 : vector<8x1xf32> to vector<8x8xf32>
    %209 = arith.mulf %204, %208 : vector<8x8xf32>
    %cst_75 = arith.constant dense<0.000000e+00> : vector<8x8xf32>
    %210 = tpu.matmul %209, %196, %cst_75 {dimension_numbers = #tpu.dot_dimension_numbers<[1], [0], [0], [1], [0, 0, 1, 1], [], []>} : vector<8x8xf32>, vector<8x8xf32>, vector<8x8xf32> -> vector<8x8xf32>
    %c104_76 = arith.constant 104 : index
    %c0_77 = arith.constant 0 : index
    %211 = vector.load %arg5[%c104_76, %c0_77] : memref<224x32xf32, #tpu.memory_space<vmem>>, vector<8x32xf32>
    %cst_78 = arith.constant dense<0.000000e+00> : vector<8x32xf32>
    %212 = tpu.matmul %210, %211, %cst_78 {dimension_numbers = #tpu.dot_dimension_numbers<[1], [0], [0], [1], [0, 0, 1, 1], [], []>} : vector<8x8xf32>, vector<8x32xf32>, vector<8x32xf32> -> vector<8x32xf32>
    %213 = arith.addf %193, %212 : vector<8x32xf32>
    %214 = vector.extract_strided_slice %166 {offsets = [0, 16], sizes = [8, 8], strides = [1, 1]} : vector<8x32xf32> to vector<8x8xf32>
    %215 = vector.extract_strided_slice %172 {offsets = [0, 16], sizes = [8, 8], strides = [1, 1]} : vector<8x32xf32> to vector<8x8xf32>
    %216 = vector.extract_strided_slice %159 {offsets = [0, 16], sizes = [8, 8], strides = [1, 1]} : vector<8x32xf32> to vector<8x8xf32>
    %cst_79 = arith.constant dense<0.000000e+00> : vector<8x8xf32>
    %217 = tpu.matmul %214, %215, %cst_79 {dimension_numbers = #tpu.dot_dimension_numbers<[1], [1], [0], [0], [0, 0, 1, 0], [], []>} : vector<8x8xf32>, vector<8x8xf32>, vector<8x8xf32> -> vector<8x8xf32>
    %218 = vector.broadcast %42 : f32 to vector<8x8xf32>
    %219 = arith.mulf %217, %218 : vector<8x8xf32>
    %cst_80 = arith.constant dense<0xFF800000> : vector<8xf32>
    %220 = vector.multi_reduction <maximumf>, %219, %cst_80 [1] : vector<8x8xf32> to vector<8xf32>
    %221 = vector.shape_cast %220 : vector<8xf32> to vector<8x1xf32>
    %222 = vector.broadcast %221 : vector<8x1xf32> to vector<8x8xf32>
    %223 = arith.subf %219, %222 : vector<8x8xf32>
    %224 = math.exp %223 : vector<8x8xf32>
    %cst_81 = arith.constant dense<0.000000e+00> : vector<8xf32>
    %225 = vector.multi_reduction <add>, %224, %cst_81 [1] : vector<8x8xf32> to vector<8xf32>
    %226 = vector.shape_cast %225 : vector<8xf32> to vector<8x1xf32>
    %227 = tpu.reciprocal %226 {approx = true} : vector<8x1xf32> -> vector<8x1xf32>
    %228 = vector.broadcast %227 : vector<8x1xf32> to vector<8x8xf32>
    %229 = arith.mulf %224, %228 : vector<8x8xf32>
    %cst_82 = arith.constant dense<0.000000e+00> : vector<8x8xf32>
    %230 = tpu.matmul %229, %216, %cst_82 {dimension_numbers = #tpu.dot_dimension_numbers<[1], [0], [0], [1], [0, 0, 1, 1], [], []>} : vector<8x8xf32>, vector<8x8xf32>, vector<8x8xf32> -> vector<8x8xf32>
    %c112_83 = arith.constant 112 : index
    %c0_84 = arith.constant 0 : index
    %231 = vector.load %arg5[%c112_83, %c0_84] : memref<224x32xf32, #tpu.memory_space<vmem>>, vector<8x32xf32>
    %cst_85 = arith.constant dense<0.000000e+00> : vector<8x32xf32>
    %232 = tpu.matmul %230, %231, %cst_85 {dimension_numbers = #tpu.dot_dimension_numbers<[1], [0], [0], [1], [0, 0, 1, 1], [], []>} : vector<8x8xf32>, vector<8x32xf32>, vector<8x32xf32> -> vector<8x32xf32>
    %233 = arith.addf %213, %232 : vector<8x32xf32>
    %234 = vector.extract_strided_slice %166 {offsets = [0, 24], sizes = [8, 8], strides = [1, 1]} : vector<8x32xf32> to vector<8x8xf32>
    %235 = vector.extract_strided_slice %172 {offsets = [0, 24], sizes = [8, 8], strides = [1, 1]} : vector<8x32xf32> to vector<8x8xf32>
    %236 = vector.extract_strided_slice %159 {offsets = [0, 24], sizes = [8, 8], strides = [1, 1]} : vector<8x32xf32> to vector<8x8xf32>
    %cst_86 = arith.constant dense<0.000000e+00> : vector<8x8xf32>
    %237 = tpu.matmul %234, %235, %cst_86 {dimension_numbers = #tpu.dot_dimension_numbers<[1], [1], [0], [0], [0, 0, 1, 0], [], []>} : vector<8x8xf32>, vector<8x8xf32>, vector<8x8xf32> -> vector<8x8xf32>
    %238 = vector.broadcast %42 : f32 to vector<8x8xf32>
    %239 = arith.mulf %237, %238 : vector<8x8xf32>
    %cst_87 = arith.constant dense<0xFF800000> : vector<8xf32>
    %240 = vector.multi_reduction <maximumf>, %239, %cst_87 [1] : vector<8x8xf32> to vector<8xf32>
    %241 = vector.shape_cast %240 : vector<8xf32> to vector<8x1xf32>
    %242 = vector.broadcast %241 : vector<8x1xf32> to vector<8x8xf32>
    %243 = arith.subf %239, %242 : vector<8x8xf32>
    %244 = math.exp %243 : vector<8x8xf32>
    %cst_88 = arith.constant dense<0.000000e+00> : vector<8xf32>
    %245 = vector.multi_reduction <add>, %244, %cst_88 [1] : vector<8x8xf32> to vector<8xf32>
    %246 = vector.shape_cast %245 : vector<8xf32> to vector<8x1xf32>
    %247 = tpu.reciprocal %246 {approx = true} : vector<8x1xf32> -> vector<8x1xf32>
    %248 = vector.broadcast %247 : vector<8x1xf32> to vector<8x8xf32>
    %249 = arith.mulf %244, %248 : vector<8x8xf32>
    %cst_89 = arith.constant dense<0.000000e+00> : vector<8x8xf32>
    %250 = tpu.matmul %249, %236, %cst_89 {dimension_numbers = #tpu.dot_dimension_numbers<[1], [0], [0], [1], [0, 0, 1, 1], [], []>} : vector<8x8xf32>, vector<8x8xf32>, vector<8x8xf32> -> vector<8x8xf32>
    %c120_90 = arith.constant 120 : index
    %c0_91 = arith.constant 0 : index
    %251 = vector.load %arg5[%c120_90, %c0_91] : memref<224x32xf32, #tpu.memory_space<vmem>>, vector<8x32xf32>
    %cst_92 = arith.constant dense<0.000000e+00> : vector<8x32xf32>
    %252 = tpu.matmul %250, %251, %cst_92 {dimension_numbers = #tpu.dot_dimension_numbers<[1], [0], [0], [1], [0, 0, 1, 1], [], []>} : vector<8x8xf32>, vector<8x32xf32>, vector<8x32xf32> -> vector<8x32xf32>
    %253 = arith.addf %233, %252 : vector<8x32xf32>
    %254 = vector.broadcast %11 : vector<1x32xf32> to vector<8x32xf32>
    %255 = arith.addf %253, %254 : vector<8x32xf32>
    %256 = arith.addf %156, %255 : vector<8x32xf32>
    %257 = arith.mulf %256, %256 : vector<8x32xf32>
    %cst_93 = arith.constant dense<0.000000e+00> : vector<8xf32>
    %258 = vector.multi_reduction <add>, %257, %cst_93 [1] : vector<8x32xf32> to vector<8xf32>
    %259 = vector.shape_cast %258 : vector<8xf32> to vector<8x1xf32>
    %cst_94 = arith.constant 3.200000e+01 : f32
    %260 = vector.broadcast %cst_94 : f32 to vector<8x1xf32>
    %261 = arith.divf %259, %260 : vector<8x1xf32>
    %cst_95 = arith.constant 1.1920929E-7 : f32
    %262 = vector.broadcast %cst_95 : f32 to vector<8x1xf32>
    %263 = arith.addf %261, %262 : vector<8x1xf32>
    %264 = math.rsqrt %263 : vector<8x1xf32>
    %265 = vector.broadcast %264 : vector<8x1xf32> to vector<8x32xf32>
    %266 = arith.mulf %256, %265 : vector<8x32xf32>
    %267 = vector.broadcast %15 : vector<1x32xf32> to vector<8x32xf32>
    %268 = arith.mulf %266, %267 : vector<8x32xf32>
    %269 = tpu.concatenate %155, %268 in 0 : vector<8x32xf32>, vector<8x32xf32> -> vector<16x32xf32>
    %cst_96 = arith.constant dense<0.000000e+00> : vector<16x32xf32>
    %270 = tpu.matmul %269, %5, %cst_96 {dimension_numbers = #tpu.dot_dimension_numbers<[1], [0], [0], [1], [0, 0, 1, 1], [], []>} : vector<16x32xf32>, vector<32x32xf32>, vector<16x32xf32> -> vector<16x32xf32>
    %271 = vector.broadcast %12 : vector<1x32xf32> to vector<16x32xf32>
    %272 = arith.addf %270, %271 : vector<16x32xf32>
    %273 = arith.mulf %272, %272 : vector<16x32xf32>
    %274 = arith.mulf %272, %273 : vector<16x32xf32>
    %cst_97 = arith.constant 4.471500e-02 : f32
    %275 = vector.broadcast %cst_97 : f32 to vector<16x32xf32>
    %276 = arith.mulf %275, %274 : vector<16x32xf32>
    %277 = arith.addf %272, %276 : vector<16x32xf32>
    %cst_98 = arith.constant 0.797884583 : f32
    %278 = vector.broadcast %cst_98 : f32 to vector<16x32xf32>
    %279 = arith.mulf %278, %277 : vector<16x32xf32>
    %280 = math.tanh %279 : vector<16x32xf32>
    %cst_99 = arith.constant 1.000000e+00 : f32
    %281 = vector.broadcast %cst_99 : f32 to vector<16x32xf32>
    %282 = arith.addf %281, %280 : vector<16x32xf32>
    %cst_100 = arith.constant 5.000000e-01 : f32
    %283 = vector.broadcast %cst_100 : f32 to vector<16x32xf32>
    %284 = arith.mulf %283, %282 : vector<16x32xf32>
    %285 = arith.mulf %272, %284 : vector<16x32xf32>
    %cst_101 = arith.constant dense<0.000000e+00> : vector<16x32xf32>
    %286 = tpu.matmul %269, %6, %cst_101 {dimension_numbers = #tpu.dot_dimension_numbers<[1], [0], [0], [1], [0, 0, 1, 1], [], []>} : vector<16x32xf32>, vector<32x32xf32>, vector<16x32xf32> -> vector<16x32xf32>
    %287 = vector.broadcast %13 : vector<1x32xf32> to vector<16x32xf32>
    %288 = arith.addf %286, %287 : vector<16x32xf32>
    %289 = arith.mulf %285, %288 : vector<16x32xf32>
    %cst_102 = arith.constant dense<0.000000e+00> : vector<16x32xf32>
    %290 = tpu.matmul %289, %7, %cst_102 {dimension_numbers = #tpu.dot_dimension_numbers<[1], [0], [0], [1], [0, 0, 1, 1], [], []>} : vector<16x32xf32>, vector<32x32xf32>, vector<16x32xf32> -> vector<16x32xf32>
    %291 = vector.broadcast %14 : vector<1x32xf32> to vector<16x32xf32>
    %292 = arith.addf %290, %291 : vector<16x32xf32>
    %293 = arith.addf %269, %292 : vector<16x32xf32>
    %294 = arith.mulf %293, %293 : vector<16x32xf32>
    %cst_103 = arith.constant dense<0.000000e+00> : vector<16xf32>
    %295 = vector.multi_reduction <add>, %294, %cst_103 [1] : vector<16x32xf32> to vector<16xf32>
    %296 = vector.shape_cast %295 : vector<16xf32> to vector<16x1xf32>
    %cst_104 = arith.constant 3.200000e+01 : f32
    %297 = vector.broadcast %cst_104 : f32 to vector<16x1xf32>
    %298 = arith.divf %296, %297 : vector<16x1xf32>
    %cst_105 = arith.constant 1.1920929E-7 : f32
    %299 = vector.broadcast %cst_105 : f32 to vector<16x1xf32>
    %300 = arith.addf %298, %299 : vector<16x1xf32>
    %301 = math.rsqrt %300 : vector<16x1xf32>
    %302 = vector.broadcast %301 : vector<16x1xf32> to vector<16x32xf32>
    %303 = arith.mulf %293, %302 : vector<16x32xf32>
    %304 = vector.broadcast %16 : vector<1x32xf32> to vector<16x32xf32>
    %305 = arith.mulf %303, %304 : vector<16x32xf32>
    %c0_106 = arith.constant 0 : index
    %c0_107 = arith.constant 0 : index
    %306 = vector.load %arg7[%c0_106, %c0_107] : memref<16x32xf32, #tpu.memory_space<vmem>>, vector<16x32xf32>
    tpu.vector_store %arg7[%c0_106, %c0_107], %305 {strides = array<i32>} : memref<16x32xf32, #tpu.memory_space<vmem>>, vector<16x32xf32>,
    return
  }
  func.func @transform_0(%arg0: i32) -> (i32, i32) {
    %c0_i32 = arith.constant 0 : i32
    %c0_i32_0 = arith.constant 0 : i32
    %c0_i32_1 = arith.constant 0 : i32
    return %c0_i32, %c0_i32_0 : i32, i32
  }
  func.func @transform_1(%arg0: i32) -> (i32, i32) {
    %c0_i32 = arith.constant 0 : i32
    %c0_i32_0 = arith.constant 0 : i32
    %c0_i32_1 = arith.constant 0 : i32
    return %c0_i32, %c0_i32_0 : i32, i32
  }
  func.func @transform_2(%arg0: i32) -> (i32, i32) {
    %c0_i32 = arith.constant 0 : i32
    %c0_i32_0 = arith.constant 0 : i32
    %c0_i32_1 = arith.constant 0 : i32
    return %c0_i32, %c0_i32_0 : i32, i32
  }
  func.func @transform_3(%arg0: i32) -> (i32, i32) {
    %c0_i32 = arith.constant 0 : i32
    %c0_i32_0 = arith.constant 0 : i32
    %c0_i32_1 = arith.constant 0 : i32
    return %c0_i32, %c0_i32_0 : i32, i32
  }
  func.func @transform_4(%arg0: i32) -> (i32, i32) {
    %c0_i32 = arith.constant 0 : i32
    %c0_i32_0 = arith.constant 0 : i32
    %c0_i32_1 = arith.constant 0 : i32
    return %c0_i32, %c0_i32_0 : i32, i32
  }
  func.func @transform_5(%arg0: i32) -> (i32, i32) {
    %c0_i32 = arith.constant 0 : i32
    %c0_i32_0 = arith.constant 0 : i32
    %c0_i32_1 = arith.constant 0 : i32
    return %c0_i32, %c0_i32_0 : i32, i32
  }
  func.func @transform_6(%arg0: i32) -> (i32, i32) {
    %c0_i32 = arith.constant 0 : i32
    %c0_i32_0 = arith.constant 0 : i32
    %c0_i32_1 = arith.constant 0 : i32
    return %c0_i32, %c0_i32_0 : i32, i32
  }
}

</mosaic_0001>

<bundles_post_ra>
// kernel: tpu_custom_call.1
= control target key start
LH: loop header
LB: loop body
LE: loop exit
PB: predicated region body
PF: predicated region fallthrough
CT: control target
= control target key end

     0   :  { %s3346_s27 = smov 127   ;;  %v3347_v11 = vmov 0   ;;  %vm65_vm0 = vcmask 261120   ;;  %s3856_s0 = inlined_call_operand.vmem [shape: f32[16,32], index: 0, kind: input, shape index: {}]   ;;  %s3857_s1 = inlined_call_operand.vmem [shape: f32[16,32], index: 1, kind: input, shape index: {}]   ;;  %s3858_s2 = inlined_call_operand.vmem [shape: f32[8,2], index: 2, kind: input, shape index: {}]   ;;  %s3859_s3 = inlined_call_operand.vmem [shape: f32[2,32], index: 3, kind: input, shape index: {}]   ;;  %s3860_s4 = inlined_call_operand.vmem [shape: f32[224,32], index: 4, kind: input, shape index: {}]   ;;  %s3861_s5 = inlined_call_operand.vmem [shape: f32[11,32], index: 5, kind: input, shape index: {}]   ;;  %s3862_s6 = inlined_call_operand.hbm [shape: f32[16,32], index: 6, kind: output, shape index: {}]  }
   0x1   :  { %v313_v0 = vld [vmem:[%s3858_s2] sm:$0xff]  ;;  %v33_v2 = vld [vmem:[%s3860_s4 + $0x28] sm:$0xff]  ;;  %v34_v6 = vld [vmem:[%s3860_s4 + $0x30] sm:$0xff]  ;;  %3273 = vset.pattern.permute.xlu0 %v3347_v11 }
   0x2   :  { %v32_v1 = vld [vmem:[%s3860_s4 + $0x20] sm:$0xff]  ;;  %315 = vrot.lane.b32.xlu0 %v313_v0, %s3346_s27  ;;  %v29_v5 = vld [vmem:[%s3860_s4 + $0x8] sm:$0xff]  ;;  %v35_v8 = vld [vmem:[%s3860_s4 + $0x38] sm:$0xff] }
   0x3   :  { %v3211_v3 = vpack.c.bf16 %v33_v2, %v32_v1  ;;  %v28_v4 = vld [vmem:[%s3860_s4] sm:$0xff]  ;;  %v30_v9 = vld [vmem:[%s3860_s4 + $0x10] sm:$0xff]  ;;  %v31_v10 = vld [vmem:[%s3860_s4 + $0x18] sm:$0xff]  ;;  %v3215_v12 = vpack.c.bf16 %v35_v8, %v34_v6 }
   0x4   :  { %v3203_v7 = vpack.c.bf16 %v29_v5, %v28_v4  ;;  %v3207_v13 = vpack.c.bf16 %v31_v10, %v30_v9  ;;  %v26_v14 = vld [vmem:[%s3857_s1] sm:$0xff] }
   0x5   :  { %3212 = vmatprep.subr.bf16.mxu1 %v3211_v3 }
   0x6   :  { %11 = vsyncpa [#allocation3], 0  ;;  %3214 = vmatpush3.bf16.msra.mxu1 %v3211_v3  ;;  %3204 = vmatprep.subr.bf16.mxu0 %v3203_v7  ;;  %v27_v15 = vld [vmem:[%s3857_s1 + $0x8] sm:$0xff]  ;;  %v2871_v19 = vld [vmem:[%s3861_s5 + $0x1] ss:$0 sm:$0xff]  ;;  %s3348_s1 = smov 32  }
   0x7   :  { %3206 = vmatpush3.bf16.msra.mxu0 %v3203_v7  ;;  %3216 = vmatprep.subr.bf16.mxu1 %v3215_v12  ;;  %v2868_v20 = vld [vmem:[%s3861_s5] ss:$0 sm:$0xff]  ;;  %v2877_v29 = vld [vmem:[%s3861_s5 + $0x9] ss:$0 sm:$0xff]  ;;  %v3349_v43 = vmov 683565275  }
   0x8   :  { %3208 = vmatprep.subr.bf16.mxu0 %v3207_v13  ;;  %3036 = vmatprep.mubr.msk.f32.mxu1 %vm65_vm0, %v26_v14  ;;  %v3350_v45 = vmov 2475754826   ;;  %v3351_v47 = vmov 2131351028   ;;  %v3352_v49 = vmov 2102212464  }
   0x9   :  { %3025 = vmatprep.mubr.msk.f32.mxu0 %vm65_vm0, %v26_v14  ;;  %v3353_v51 = vmov 920167782   ;;  %v3354_v57 = vmov 1326507024   ;;  %s3355_s27 = smov 16   ;;  %s3358_s28 = smov 112  }
   0xa   :  { %3218 = vmatpush3.bf16.msra.mxu1 %v3215_v12  ;;  %s3359_s18 = smov 120   ;;  %s3360_s24 = smov 104  }
   0xb   :  { %3210 = vmatpush3.bf16.msra.mxu0 %v3207_v13  ;;  %s3361_s11 = smov [#allocation2]  }
   0xc   :  { %s2857_s12 = sshll.u32 %s3361_s11, 4  ;;  %s2858_s12 = int_to_ptr.vmem [resolvable:$true] %s2857_s12 }
   0xd   :  { %3037 = vmatmul.mubr.msk.f32.vlgmr.msra.gmra.mrb[0].mxu1 %vm65_vm0, %v27_v15  ;;  %s3322_s13 = scalar_lea.vmem %s2858_s12, 256  ;;  %p3327_p1 = scmp.lt.s32.totalorder %s2858_s12, %s2858_s12 }
   0xe   :  { %3026 = vmatmul.mubr.msk.f32.vlgmr.msra.gmra.mrb[0].mxu0 %vm65_vm0, %v27_v15  ;;  %p3323_p0 = scmp.ne.s32.totalorder %s2858_s12, %s3322_s13  ;;  %p3328_p2 = scmp.lt.s32.totalorder %s3322_s13, %s3322_s13 }
  0x10   :  { %p3329_p3 = por %p3328_p2, %p3327_p1 }
  0x12   :  { %p3330_p4 = pnand %p3329_p3, %p3323_p0 }
  0x74   :  { %v316_v16 = vpop.permute.xlu0 %315 }
  0x75   :  { %v318_v17 = vadd.f32 %v316_v16, %v313_v0 }
  0x77   :  { %v319_v18 = vmul.f32 0.5, %v318_v17 }
  0x79   :  { %322 = vperm.xlu0 %3273, %v319_v18  }
  0xe0   :  { %v3038_v21 = vpop.f32.mrb[0].mxu1 }
  0xe1   :  { %v3442_v22 = vadd.f32 %v3038_v21, %v2871_v19  ;;  %v217_v23 = vpop.f32.mrb[1].mxu1  ;;  %v3027_v24 = vpop.f32.mrb[0].mxu0 }
  0xe2   :  { %v3444_v25 = vadd.f32 %v2871_v19, %v217_v23  ;;  %v3446_v26 = vadd.f32 %v3027_v24, %v2868_v20  ;;  %v138_v27 = vpop.f32.mrb[1].mxu0 }
  0xe3   :  { %v3450_v28 = vadd.f32 %v2868_v20, %v138_v27 }
  0xe4   :  { %567 = vrot.lane.b32.xlu1 %v3444_v25, %s3348_s1 }
  0xe8   :  { %545 = vrot.lane.b32.xlu1 %v3450_v28, %s3348_s1 }
  0xf8   :  { %v323_v30 = vpop.permute.xlu0 %322 }
  0xf9   :  { %v3457_v31 = vmul.f32 %v2877_v29, %v323_v30 }
  0xfb   :  { %v333_v32 = vand.u32 2139095040, %v3457_v31  ;;  %v330_v34 = vand.u32 2147483647, %v3457_v31  ;;  %vm332_vm8 = vcmp.lt.s32.totalorder %v3457_v31, 0 }
  0xfd   :  { %v334_v33 = vshrl.u32 %v333_v32, 23  ;;  %v337_v37 = vand.u32 8388607, %v330_v34  ;;  %vm331_vm9 = vcmp.le.f32.partialorder %v330_v34, 0.7853982 }
  0xff   :  { %v2878_v35 = vadd.s32 4294967169, %v334_v33  ;;  %v338_v40 = vor.u32 8388608, %v337_v37 }
 0x101   :  { %v340_v36 = vadd.s32 1, %v2878_v35  ;;  %v378_v62 = vshll.u32 %v338_v40, 8 }
 0x103   :  { %vm341_vm1 = vcmp.gt.s32.totalorder %v340_v36, 0 }
 0x104   :  { %v342_v38 = vsel %vm341_vm1, %v340_v36, 0  ;;  %vm422_vm1 = vweird.f32 %v3457_v31 }
 0x105   :  { %v344_v39 = vand.u32 31, %v342_v38  ;;  %v343_v41 = vshrl.u32 %v342_v38, 5 }
 0x107   :  { %v345_v42 = vsub.s32 32, %v344_v39  ;;  %v347_v44 = vshll.u32 %v3349_v43, %v344_v39  ;;  %v350_v46 = vshll.u32 %v3350_v45, %v344_v39  ;;  %v353_v48 = vshll.u32 %v3351_v47, %v344_v39 }
 0x108   :  { %v356_v50 = vshll.u32 %v3352_v49, %v344_v39  ;;  %v359_v52 = vshll.u32 %v3353_v51, %v344_v39  ;;  %vm362_vm2 = vcmp.lt.s32.totalorder %v343_v41, 1  ;;  %vm365_vm3 = vcmp.lt.s32.totalorder %v343_v41, 4 }
 0x109   :  { %v348_v53 = vshrl.u32 %v3350_v45, %v345_v42  ;;  %v351_v54 = vshrl.u32 %v3351_v47, %v345_v42  ;;  %v354_v55 = vshrl.u32 %v3352_v49, %v345_v42  ;;  %v357_v56 = vshrl.u32 %v3353_v51, %v345_v42 }
 0x10a   :  { %v360_v58 = vshrl.u32 %v3354_v57, %v345_v42  ;;  %v346_v63 = vshrl.u32 %v3349_v43, %v345_v42  ;;  %vm364_vm4 = vcmp.lt.s32.totalorder %v343_v41, 3  ;;  %vm363_vm5 = vcmp.lt.s32.totalorder %v343_v41, 2 }
 0x10b   :  { %v349_v59 = vor.u32 %v348_v53, %v347_v44  ;;  %v352_v60 = vor.u32 %v351_v54, %v350_v46  ;;  %v355_v61 = vor.u32 %v354_v55, %v353_v48  ;;  %v358_v0 = vor.u32 %v357_v56, %v356_v50 }
 0x10c   :  { %v361_v1 = vor.u32 %v360_v58, %v359_v52 }
 0x10d   :  { %v367_v2 = vsel %vm365_vm3, %v355_v61, 2102212464  ;;  %v370_v3 = vsel %vm362_vm2, %v349_v59, %v352_v60  ;;  %v374_v4 = vsel %vm362_vm2, %v352_v60, %v355_v61  ;;  %v371_v5 = vsel %vm365_vm3, %v358_v0, 920167782 }
 0x10e   :  { %v375_v6 = vsel %vm365_vm3, %v361_v1, 1326507024  ;;  %v372_v7 = vsel %vm364_vm4, %v355_v61, %v371_v5  ;;  %v366_v9 = vsel %vm362_vm2, %v346_v63, %v349_v59  ;;  %v368_v10 = vsel %vm364_vm4, %v352_v60, %v367_v2  ;;  %v2886_v63 = vld [vmem:[%s3861_s5 + $0xa] ss:$0 sm:$0xff] }
 0x10f   :  { %v376_v8 = vsel %vm364_vm4, %v358_v0, %v375_v6  ;;  %v373_v11 = vsel %vm363_vm5, %v370_v3, %v372_v7  ;;  %v369_v17 = vsel %vm363_vm5, %v366_v9, %v368_v10  ;;  %vm544_vm2 = vcmask 1047808  }
 0x110   :  { %v377_v12 = vsel %vm363_vm5, %v374_v4, %v376_v8  ;;  %v3469_v15 = vmul.u32.u64.low %v378_v62, %v373_v11  ;;  %v3470_v16 = vmul.u32.u64.high %v378_v62, %v373_v11, %v3469_v15  ;;  %v385_v19 = vmul.u32 %v378_v62, %v369_v17 }
 0x111   :  { %v3466_v13 = vmul.u32.u64.low %v378_v62, %v377_v12  ;;  %v3467_v14 = vmul.u32.u64.high %v378_v62, %v377_v12, %v3466_v13  ;;  %vm3357_vm3 = vmmov 0   ;;  %vm580_vm4 = vcmask 64512  }
 0x112   :  { %v388_v18 = vadd.s32 1, %v3470_v16 }
 0x113   :  { %vm387_vm6 = vc.u32 %v3467_v14, %v3469_v15  ;;  %v386_v37 = vadd.s32 %v3469_v15, %v3467_v14 }
 0x114   :  { %v389_v20 = vsel %vm387_vm6, %v388_v18, %v3470_v16 }
 0x115   :  { %v390_v21 = vadd.s32 %v389_v20, %v385_v19  ;;  %v2887_v19 = vld [vmem:[%s3859_s3] ss:$0 sm:$0xff] }
 0x117   :  { %v391_v23 = vadd.s32 536870912, %v390_v21 }
 0x119   :  { %v392_v24 = vshrl.u32 %v391_v23, 30 }
 0x11b   :  { %v393_v27 = vshll.u32 %v392_v24, 30  ;;  %v416_v49 = vsub.s32 4, %v392_v24 }
 0x11d   :  { %v394_v29 = vsub.s32 %v390_v21, %v393_v27  ;;  %v417_v52 = vsel %vm332_vm8, %v416_v49, %v392_v24  ;;  %v2874_v49 = vld [vmem:[%s3861_s5 + $0x2] ss:$0 sm:$0xff] }
 0x11e   :  { %v419_v54 = vsel %vm331_vm9, 0, %v417_v52 }
 0x11f   :  { %v396_v30 = vsub.s32 0, %v394_v29  ;;  %v526_v55 = vadd.s32 3, %v419_v54  ;;  %v423_v57 = vand.u32 3, %v419_v54 }
 0x121   :  { %v2879_v32 = vmin.u32 %v396_v30, %v394_v29  ;;  %v527_v56 = vand.u32 3, %v526_v55  ;;  %vm428_vm11 = vcmp.eq.s32.totalorder %v423_v57, 2  ;;  %vm425_vm13 = vcmp.eq.s32.totalorder %v423_v57, 0  ;;  %v36_v30 = vld [vmem:[%s3860_s4 + $0x40] sm:$0xff] }
 0x122   :  { %vm424_vm15 = vcmp.lt.s32.totalorder %v423_v57, 2 }
 0x123   :  { %v398_v33 = vclz %v2879_v32  ;;  %vm532_vm10 = vcmp.eq.s32.totalorder %v527_v56, 2  ;;  %vm529_vm12 = vcmp.eq.s32.totalorder %v527_v56, 0  ;;  %vm528_vm14 = vcmp.lt.s32.totalorder %v527_v56, 2  ;;  %v38_v32 = vld [vmem:[%s3860_s4 + $0x50] sm:$0xff] }
 0x125   :  { %v2880_v35 = vadd.s32 4294967294, %v398_v33 }
 0x127   :  { %vm2881_vm7 = vcmp.lt.s32.totalorder %v2880_v35, 0 }
 0x128   :  { %v401_v36 = vsel %vm2881_vm7, 0, %v2880_v35  ;;  %v39_v35 = vld [vmem:[%s3860_s4 + $0x58] sm:$0xff] }
 0x129   :  { %v402_v38 = vsub.s32 32, %v401_v36  ;;  %v406_v39 = vsub.s32 4294967266, %v401_v36  ;;  %v403_v40 = vshll.u32 %v394_v29, %v401_v36  ;;  %v3538_v36 = vld [vmem:[%s3856_s0] sm:$0xff] }
 0x12a   :  { %3047 = vmatprep.mubr.msk.f32.mxu0 %vm65_vm0, %v3538_v36 }
 0x12b   :  { %v404_v41 = vshrl.u32 %v386_v37, %v402_v38  ;;  %v407_v42 = vadd.s32 127, %v406_v39  ;;  %v3223_v37 = vpack.c.bf16 %v39_v35, %v38_v32  ;;  %v3545_v38 = vld [vmem:[%s3856_s0 + $0x8] sm:$0xff] }
 0x12d   :  { %v405_v43 = vor.u32 %v404_v41, %v403_v40  ;;  %v408_v44 = vshll.u32 %v407_v42, 23 }
 0x12f   :  { %v409_v45 = vor.u32 4788187, %v408_v44  ;;  %v412_v47 = vcvt.s32.f32 %v405_v43 }
 0x131   :  { %v410_v46 = vand.u32 2147483647, %v409_v45 }
 0x133   :  { %v413_v48 = vmul.f32 %v412_v47, %v410_v46 }
 0x135   :  { %v414_v50 = vxor.u32 2147483648, %v413_v48 }
 0x137   :  { %v415_v51 = vsel %vm332_vm8, %v414_v50, %v413_v48 }
 0x138   :  { %v418_v53 = vsel %vm331_vm9, %v3457_v31, %v415_v51  ;;  %v3356_v31 = vmov 0.0  }
 0x139   :  { %3274 = vcosq.f32 %v418_v53  ;;  %3050 = vmatprep.subr.mxu1 %v3356_v31  ;;  %3052 = vmatprep.mubr.msk.f32.mxu1 %vm3357_vm3, %v3356_v31 }
 0x13a   :  { %3276 = vsinq.f32 %v418_v53 }
 0x143   :  { %v3275_v58 = vpop.eup %3274 }
 0x144   :  { %v3277_v59 = vpop.eup %3276  ;;  %v429_v60 = vxor.u32 2147483648, %v3275_v58 }
 0x145   :  { %v426_v61 = vxor.u32 2147483648, %v3277_v59 }
 0x146   :  { %v534_v62 = vsel %vm532_vm10, %v429_v60, %v3277_v59  ;;  %v430_v34 = vsel %vm428_vm11, %v429_v60, %v3277_v59 }
 0x147   :  { %v531_v0 = vsel %vm529_vm12, %v3275_v58, %v426_v61  ;;  %v427_v1 = vsel %vm425_vm13, %v3275_v58, %v426_v61 }
 0x148   :  { %v535_v2 = vsel %vm528_vm14, %v531_v0, %v534_v62  ;;  %v431_v3 = vsel %vm424_vm15, %v427_v1, %v430_v34 }
 0x149   :  { %v536_v4 = vsel %vm422_vm1, nan, %v535_v2  ;;  %v3484_v5 = vsel %vm422_vm1, nan, %v431_v3 }
 0x14a   :  { %v541_v6 = vmul.f32 %v2886_v63, %v536_v4  ;;  %v566_v18 = vmul.f32 %v3484_v5, %v3444_v25  ;;  %v543_v24 = vmul.f32 %v3484_v5, %v3450_v28 }
 0x14c   :  { %552 = vrot.lane.b32.xlu0 %v541_v6, %s3355_s27  ;;  %v3587_v6 = vld [vmem:[%s3860_s4 + $0x68] sm:$0xff] }
 0x156   :  { %v568_v7 = vpop.permute.xlu1 %567 }
 0x157   :  { %v569_v8 = vsel %vm544_vm2, %v568_v7, %v3444_v25 }
 0x158   :  { %570 = vrot.lane.b32.xlu1 %v569_v8, %s3348_s1 }
 0x15a   :  { %v546_v9 = vpop.permute.xlu1 %545 }
 0x15b   :  { %v547_v10 = vsel %vm544_vm2, %v546_v9, %v3450_v28 }
 0x15c   :  { %548 = vrot.lane.b32.xlu1 %v547_v10, %s3348_s1  ;;  %v3594_v10 = vld [vmem:[%s3860_s4 + $0x60] sm:$0xff] }
 0x1be   :  { %v3495_v12 = vpop.permute.xlu0 %552 }
 0x1ca   :  { %v571_v11 = vpop.permute.xlu1 %570 }
 0x1cb   :  { %v572_v13 = vsel %vm544_vm2, %v571_v11, %v3444_v25 }
 0x1cc   :  { %v573_v14 = vmul.f32 %v572_v13, %v3495_v12 }
 0x1ce   :  { %575 = vrot.lane.b32.xlu0 %v573_v14, %s3358_s28  ;;  %v549_v15 = vpop.permute.xlu1 %548 }
 0x1cf   :  { %v550_v16 = vsel %vm544_vm2, %v549_v15, %v3450_v28  ;;  %v37_v28 = vld [vmem:[%s3860_s4 + $0x48] sm:$0xff] }
 0x1d0   :  { %v555_v17 = vmul.f32 %v3495_v12, %v550_v16  ;;  %v3219_v33 = vpack.c.bf16 %v37_v28, %v36_v30 }
 0x1d2   :  { %557 = vrot.lane.b32.xlu1 %v555_v17, %s3358_s28  ;;  %3220 = vmatprep.subr.bf16.mxu0 %v3219_v33 }
 0x1d3   :  { %3222 = vmatpush3.bf16.msra.mxu0 %v3219_v33 }
 0x1d4   :  { %3224 = vmatprep.subr.bf16.mxu0 %v3223_v37 }
 0x1d7   :  { %3226 = vmatpush3.bf16.msra.mxu0 %v3223_v37 }
 0x1d8   :  { %3070 = vmatprep.subr.mxu0 %v3356_v31 }
 0x1da   :  { %3048 = vmatmul.mubr.msk.f32.vlgmr.msra.gmra.mrb[2].mxu0 %vm65_vm0, %v3545_v38 }
 0x1db   :  { %3072 = vmatprep.mubr.msk.f32.mxu0 %vm3357_vm3, %v3356_v31  ;;  %3071 = vmatpush3.msra.mxu0 %v3587_v6 }
 0x1dc   :  { %3080 = vmatprep.subr.mxu0 %v3356_v31 }
 0x240   :  { %v576_v20 = vpop.permute.xlu0 %575 }
 0x241   :  { %v578_v21 = vadd.f32 %v576_v20, %v566_v18 }
 0x243   :  { %v3510_v23 = vmul.f32 %v2887_v19, %v578_v21 }
 0x244   :  { %v558_v27 = vpop.permute.xlu1 %557 }
 0x245   :  { %v560_v29 = vadd.f32 %v558_v27, %v543_v24  ;;  %3051 = vmatpush3.xpose.msk.msra.mxu1 %vm580_vm4, %v3510_v23 }
 0x246   :  { %3055 = vmatprep.subr.mxu1 %v3356_v31 }
 0x247   :  { %v3517_v25 = vmul.f32 %v2887_v19, %v560_v29 }
 0x249   :  { %3053 = vmatmul.mubr.msk.f32.vlgmr.msra.gmra.mrb[2].mxu1 %vm580_vm4, %v3517_v25 }
 0x24a   :  { %3057 = vmatprep.mubr.msk.f32.mxu1 %vm3357_vm3, %v3356_v31 }
 0x2ad   :  { %v3049_v48 = vpop.f32.mrb[2].mxu0 }
 0x2ae   :  { %v302_v50 = vpop.f32.mrb[3].mxu0  ;;  %v3561_v51 = vadd.f32 %v3049_v48, %v2874_v49 }
 0x2af   :  { %v3563_v52 = vadd.f32 %v2874_v49, %v302_v50 }
 0x2b1   :  { %3056 = vmatpush3.msra.mxu1 %v3563_v52 }
 0x2b2   :  { %3060 = vmatprep.subr.mxu1 %v3356_v31 }
 0x31c   :  { %v653_v39 = vpop.f32.mrb[2].mxu1 }
 0x31d   :  { %v657_v40 = vmul.f32 0.35355338, %v653_v39  ;;  %v3054_v41 = vpop.f32.mrb[3].mxu1 }
 0x31f   :  { %v658_v42 = vsel %vm580_vm4, %v657_v40, -inf }
 0x320   :  { %659 = vmax.xlane.f32.xlu0 %v658_v42 }
 0x336   :  { %745 = vrot.lane.b32.xlu0 %v3510_v23, %s3359_s18 }
 0x3ad   :  { %v660_v43 = vpop.xlane.xlu0 %659 }
 0x3ae   :  { %v661_v44 = vsub.f32 %v657_v40, %v660_v43 }
 0x3b0   :  { %v662_v45 = vmul.f32 1.442695, %v661_v44 }
 0x3b1   :  { %v746_v56 = vpop.permute.xlu0 %745 }
 0x3b2   :  { %3278 = vpow2.f32 %v662_v45 }
 0x3bc   :  { %v3279_v46 = vpop.eup %3278 }
 0x3bd   :  { %v664_v47 = vsel %vm580_vm4, %v3279_v46, 0.0 }
 0x3be   :  { %665 = vadd.xlane.f32.xlu1 %v664_v47 }
 0x3cf   :  { %743 = vrot.lane.b32.xlu1 %v3517_v25, %s3359_s18 }
 0x44b   :  { %v666_v53 = vpop.xlane.xlu1 %665 }
 0x44c   :  { %3280 = vrcp.f32 %v666_v53 }
 0x44f   :  { %v744_v57 = vpop.permute.xlu1 %743 }
 0x456   :  { %v3281_v54 = vpop.eup %3280 }
 0x457   :  { %v668_v55 = vmul.f32 %v3281_v54, %v3279_v46  ;;  %v3644_v46 = vld [vmem:[%s3860_s4 + $0x70] sm:$0xff] }
 0x459   :  { %3058 = vmatmul.mubr.msk.f32.vlgmr.msra.gmra.mrb[4].mxu1 %vm580_vm4, %v668_v55 }
 0x45a   :  { %3061 = vmatpush3.xpose.msk.msra.mxu1 %vm580_vm4, %v746_v56  ;;  %3062 = vmatprep.mubr.msk.f32.mxu1 %vm3357_vm3, %v3356_v31 }
 0x45b   :  { %3065 = vmatprep.subr.mxu1 %v3356_v31 }
 0x45d   :  { %3063 = vmatmul.mubr.msk.f32.vlgmr.msra.gmra.mrb[6].mxu1 %vm580_vm4, %v744_v57 }
 0x45e   :  { %3067 = vmatprep.mubr.msk.f32.mxu1 %vm3357_vm3, %v3356_v31 }
 0x52c   :  { %v738_v58 = vpop.f32.mrb[4].mxu1 }
 0x52d   :  { %v3059_v59 = vpop.f32.mrb[5].mxu1 }
 0x530   :  { %v817_v60 = vpop.f32.mrb[6].mxu1 }
 0x531   :  { %v821_v61 = vmul.f32 0.35355338, %v817_v60  ;;  %v3064_v62 = vpop.f32.mrb[7].mxu1 }
 0x533   :  { %v822_v34 = vsel %vm580_vm4, %v821_v61, -inf }
 0x534   :  { %823 = vmax.xlane.f32.xlu0 %v822_v34 }
 0x54a   :  { %834 = vrot.lane.b32.xlu0 %v3563_v52, %s3359_s18 }
 0x54e   :  { %1057 = vrot.lane.b32.xlu0 %v3517_v25, %s3358_s28 }
 0x5c1   :  { %v824_v63 = vpop.xlane.xlu0 %823 }
 0x5c2   :  { %v825_v0 = vsub.f32 %v821_v61, %v824_v63  ;;  %v1578_v61 = vmul.f32 %v3484_v5, %v3442_v22 }
 0x5c4   :  { %v826_v1 = vmul.f32 1.442695, %v825_v0  ;;  %v1560_v0 = vmul.f32 %v3484_v5, %v3446_v26  ;;  %v3682_v5 = vld [vmem:[%s3860_s4 + $0x78] sm:$0xff] }
 0x5c5   :  { %v835_v2 = vpop.permute.xlu0 %834 }
 0x5c6   :  { %3282 = vpow2.f32 %v826_v1  ;;  %3066 = vmatpush3.msra.mxu1 %v835_v2 }
 0x5c7   :  { %3075 = vmatprep.subr.mxu1 %v3356_v31 }
 0x5c9   :  { %v1058_v15 = vpop.permute.xlu0 %1057 }
 0x5d0   :  { %v3283_v3 = vpop.eup %3282 }
 0x5d1   :  { %v828_v4 = vsel %vm580_vm4, %v3283_v3, 0.0 }
 0x5d2   :  { %829 = vadd.xlane.f32.xlu1 %v828_v4 }
 0x5e3   :  { %1059 = vrot.lane.b32.xlu1 %v3510_v23, %s3358_s28 }
 0x65f   :  { %v830_v7 = vpop.xlane.xlu1 %829 }
 0x660   :  { %3284 = vrcp.f32 %v830_v7 }
 0x663   :  { %v1060_v13 = vpop.permute.xlu1 %1059 }
 0x66a   :  { %v3285_v8 = vpop.eup %3284 }
 0x66b   :  { %v832_v9 = vmul.f32 %v3285_v8, %v3283_v3 }
 0x66d   :  { %3068 = vmatmul.mubr.msk.f32.vlgmr.msra.gmra.mrb[8].mxu1 %vm580_vm4, %v832_v9 }
 0x66e   :  { %3076 = vmatpush3.msra.mxu1 %v3594_v10  ;;  %3077 = vmatprep.mubr.msk.f32.mxu1 %vm3357_vm3, %v3356_v31 }
 0x66f   :  { %3085 = vmatprep.subr.mxu1 %v3356_v31 }
 0x671   :  { %3078 = vmatmul.mubr.msk.f32.vlgmr.msra.gmra.mrb[10].mxu1 %vm580_vm4, %v738_v58 }
 0x672   :  { %3087 = vmatprep.mubr.msk.f32.mxu1 %vm3357_vm3, %v3356_v31 }
 0x740   :  { %v906_v11 = vpop.f32.mrb[8].mxu1 }
 0x741   :  { %v3069_v14 = vpop.f32.mrb[9].mxu1  ;;  %3073 = vmatmul.mubr.msk.f32.vlgmr.msra.gmra.mrb[4].mxu0 %vm580_vm4, %v906_v11 }
 0x742   :  { %3081 = vmatpush3.xpose.msk.msra.mxu0 %vm580_vm4, %v1060_v13  ;;  %3082 = vmatprep.mubr.msk.f32.mxu0 %vm3357_vm3, %v3356_v31 }
 0x743   :  { %3090 = vmatprep.subr.mxu0 %v3356_v31 }
 0x744   :  { %v1053_v16 = vpop.f32.mrb[10].mxu1 }
 0x745   :  { %v3079_v17 = vpop.f32.mrb[11].mxu1  ;;  %3083 = vmatmul.mubr.msk.f32.vlgmr.msra.gmra.mrb[6].mxu0 %vm580_vm4, %v1058_v15 }
 0x746   :  { %3092 = vmatprep.mubr.msk.f32.mxu0 %vm3357_vm3, %v3356_v31  ;;  %3091 = vmatpush3.msra.mxu0 %v3644_v46 }
 0x747   :  { %3100 = vmatprep.subr.mxu0 %v3356_v31 }
 0x814   :  { %v980_v18 = vpop.f32.mrb[4].mxu0 }
 0x815   :  { %v3612_v19 = vadd.f32 %v1053_v16, %v980_v18  ;;  %v3074_v20 = vpop.f32.mrb[5].mxu0 }
 0x818   :  { %v1131_v21 = vpop.f32.mrb[6].mxu0 }
 0x819   :  { %v1135_v24 = vmul.f32 0.35355338, %v1131_v21  ;;  %v3084_v27 = vpop.f32.mrb[7].mxu0 }
 0x81b   :  { %v1136_v29 = vsel %vm580_vm4, %v1135_v24, -inf }
 0x81c   :  { %1137 = vmax.xlane.f32.xlu1 %v1136_v29 }
 0x82d   :  { %1300 = vrot.lane.b32.xlu1 %v3510_v23, %s3360_s24 }
 0x831   :  { %1298 = vrot.lane.b32.xlu1 %v3517_v25, %s3360_s24 }
 0x835   :  { %1561 = vrot.lane.b32.xlu1 %v3446_v26, %s3348_s1 }
 0x8a9   :  { %v1138_v30 = vpop.xlane.xlu1 %1137 }
 0x8aa   :  { %v1139_v28 = vsub.f32 %v1135_v24, %v1138_v30 }
 0x8ac   :  { %v1140_v32 = vmul.f32 1.442695, %v1139_v28 }
 0x8ad   :  { %v1301_v23 = vpop.permute.xlu1 %1300 }
 0x8ae   :  { %3286 = vpow2.f32 %v1140_v32 }
 0x8b1   :  { %v1299_v25 = vpop.permute.xlu1 %1298 }
 0x8b5   :  { %v1562_v42 = vpop.permute.xlu1 %1561 }
 0x8b6   :  { %v1563_v45 = vsel %vm544_vm2, %v1562_v42, %v3446_v26 }
 0x8b8   :  { %v3287_v33 = vpop.eup %3286 }
 0x8b9   :  { %v1142_v35 = vsel %vm580_vm4, %v3287_v33, 0.0 }
 0x8ba   :  { %1143 = vadd.xlane.f32.xlu0 %v1142_v35 }
 0x8d0   :  { %1147 = vrot.lane.b32.xlu0 %v3563_v52, %s3358_s28 }
 0x8d4   :  { %1579 = vrot.lane.b32.xlu0 %v3442_v22, %s3348_s1 }
 0x947   :  { %v1144_v37 = vpop.xlane.xlu0 %1143 }
 0x948   :  { %3288 = vrcp.f32 %v1144_v37 }
 0x94b   :  { %v1148_v39 = vpop.permute.xlu0 %1147 }
 0x94c   :  { %3086 = vmatpush3.msra.mxu1 %v1148_v39 }
 0x94d   :  { %3095 = vmatprep.subr.mxu1 %v3356_v31 }
 0x94f   :  { %v1580_v40 = vpop.permute.xlu0 %1579 }
 0x950   :  { %v1581_v41 = vsel %vm544_vm2, %v1580_v40, %v3442_v22 }
 0x951   :  { %1582 = vrot.lane.b32.xlu0 %v1581_v41, %s3348_s1 }
 0x952   :  { %v3289_v43 = vpop.eup %3288 }
 0x953   :  { %v1146_v44 = vmul.f32 %v3289_v43, %v3287_v33 }
 0x955   :  { %3088 = vmatmul.mubr.msk.f32.vlgmr.msra.gmra.mrb[12].mxu1 %vm580_vm4, %v1146_v44  ;;  %1564 = vrot.lane.b32.xlu0 %v1563_v45, %s3348_s1 }
 0x956   :  { %3096 = vmatpush3.xpose.msk.msra.mxu1 %vm580_vm4, %v1301_v23  ;;  %3097 = vmatprep.mubr.msk.f32.mxu1 %vm3357_vm3, %v3356_v31 }
 0x957   :  { %3105 = vmatprep.subr.mxu1 %v3356_v31 }
 0x959   :  { %3098 = vmatmul.mubr.msk.f32.vlgmr.msra.gmra.mrb[14].mxu1 %vm580_vm4, %v1299_v25 }
 0x95a   :  { %3107 = vmatprep.mubr.msk.f32.mxu1 %vm3357_vm3, %v3356_v31  ;;  %3106 = vmatpush3.msra.mxu1 %v3682_v5 }
 0x95b   :  { %3115 = vmatprep.subr.mxu1 %v3356_v31 }
 0x9c3   :  { %v1583_v47 = vpop.permute.xlu0 %1582 }
 0x9c4   :  { %v1584_v48 = vsel %vm544_vm2, %v1583_v47, %v3442_v22 }
 0x9c5   :  { %v1585_v49 = vmul.f32 %v1584_v48, %v3495_v12 }
 0x9c7   :  { %1587 = vrot.lane.b32.xlu0 %v1585_v49, %s3358_s28  ;;  %v1565_v50 = vpop.permute.xlu0 %1564 }
 0x9c8   :  { %v1566_v53 = vsel %vm544_vm2, %v1565_v50, %v3446_v26 }
 0x9c9   :  { %v1567_v54 = vmul.f32 %v1566_v53, %v3495_v12  ;;  %v2906_v12 = vld [vmem:[%s3859_s3 + $0x1] ss:$0 sm:$0xff] }
 0x9cb   :  { %1569 = vrot.lane.b32.xlu0 %v1567_v54, %s3358_s28 }
 0xa28   :  { %v1219_v55 = vpop.f32.mrb[12].mxu1 }
 0xa29   :  { %v3089_v56 = vpop.f32.mrb[13].mxu1  ;;  %3093 = vmatmul.mubr.msk.f32.vlgmr.msra.gmra.mrb[8].mxu0 %vm580_vm4, %v1219_v55 }
 0xa2a   :  { %3102 = vmatprep.mubr.msk.f32.mxu0 %vm3357_vm3, %v3356_v31 }
 0xa2c   :  { %v1372_v57 = vpop.f32.mrb[14].mxu1 }
 0xa2d   :  { %v1376_v58 = vmul.f32 0.35355338, %v1372_v57  ;;  %v3099_v59 = vpop.f32.mrb[15].mxu1 }
 0xa2f   :  { %v1377_v60 = vsel %vm580_vm4, %v1376_v58, -inf }
 0xa30   :  { %1378 = vmax.xlane.f32.xlu1 %v1377_v60 }
 0xa39   :  { %v1588_v62 = vpop.permute.xlu0 %1587 }
 0xa3a   :  { %v1590_v34 = vadd.f32 %v1588_v62, %v1578_v61 }
 0xa3c   :  { %v3665_v63 = vmul.f32 %v2906_v12, %v1590_v34 }
 0xa3d   :  { %v1570_v1 = vpop.permute.xlu0 %1569 }
 0xa3e   :  { %v1572_v2 = vadd.f32 %v1570_v1, %v1560_v0 }
 0xa40   :  { %v3671_v3 = vmul.f32 %v2906_v12, %v1572_v2 }
 0xa41   :  { %1388 = vrot.lane.b32.xlu1 %v3563_v52, %s3360_s24 }
 0xa45   :  { %1753 = vrot.lane.b32.xlu1 %v3671_v3, %s3359_s18 }
 0xabd   :  { %v1379_v22 = vpop.xlane.xlu1 %1378 }
 0xabe   :  { %v1380_v4 = vsub.f32 %v1376_v58, %v1379_v22 }
 0xac0   :  { %v1381_v7 = vmul.f32 1.442695, %v1380_v4 }
 0xac1   :  { %v1389_v8 = vpop.permute.xlu1 %1388 }
 0xac2   :  { %3290 = vpow2.f32 %v1381_v7  ;;  %3101 = vmatpush3.msra.mxu0 %v1389_v8 }
 0xac3   :  { %3110 = vmatprep.subr.mxu0 %v3356_v31 }
 0xac5   :  { %v1754_v18 = vpop.permute.xlu1 %1753 }
 0xacc   :  { %v3291_v9 = vpop.eup %3290 }
 0xacd   :  { %v1383_v26 = vsel %vm580_vm4, %v3291_v9, 0.0 }
 0xace   :  { %1384 = vadd.xlane.f32.xlu0 %v1383_v26 }
 0xae4   :  { %1755 = vrot.lane.b32.xlu0 %v3665_v63, %s3359_s18 }
 0xafc   :  { %v1293_v52 = vpop.f32.mrb[8].mxu0 }
 0xafd   :  { %v1297_v11 = vadd.f32 %v1293_v52, %v3612_v19  ;;  %v3094_v13 = vpop.f32.mrb[9].mxu0 }
 0xb5b   :  { %v1385_v14 = vpop.xlane.xlu0 %1384 }
 0xb5c   :  { %3292 = vrcp.f32 %v1385_v14 }
 0xb5f   :  { %v1756_v17 = vpop.permute.xlu0 %1755 }
 0xb66   :  { %v3293_v15 = vpop.eup %3292 }
 0xb67   :  { %v1387_v16 = vmul.f32 %v3293_v15, %v3291_v9 }
 0xb69   :  { %3103 = vmatmul.mubr.msk.f32.vlgmr.msra.gmra.mrb[10].mxu0 %vm580_vm4, %v1387_v16 }
 0xb6a   :  { %3111 = vmatpush3.xpose.msk.msra.mxu0 %vm580_vm4, %v3665_v63  ;;  %3112 = vmatprep.mubr.msk.f32.mxu0 %vm3357_vm3, %v3356_v31 }
 0xb6b   :  { %3120 = vmatprep.subr.mxu0 %v3356_v31 }
 0xb6d   :  { %3113 = vmatmul.mubr.msk.f32.vlgmr.msra.gmra.mrb[12].mxu0 %vm580_vm4, %v3671_v3 }
 0xb6e   :  { %3121 = vmatpush3.xpose.msk.msra.mxu0 %vm580_vm4, %v1756_v17  ;;  %3122 = vmatprep.mubr.msk.f32.mxu0 %vm3357_vm3, %v3356_v31 }
 0xb6f   :  { %3130 = vmatprep.subr.mxu0 %v3356_v31 }
 0xb71   :  { %3123 = vmatmul.mubr.msk.f32.vlgmr.msra.gmra.mrb[14].mxu0 %vm580_vm4, %v1754_v18 }
 0xb72   :  { %3131 = vmatpush3.msra.mxu0 %v3587_v6  ;;  %3132 = vmatprep.mubr.msk.f32.mxu0 %vm3357_vm3, %v3356_v31 }
 0xb73   :  { %3140 = vmatprep.subr.mxu0 %v3356_v31 }
 0xc3c   :  { %v1460_v19 = vpop.f32.mrb[10].mxu0 }
 0xc3d   :  { %v3104_v20 = vpop.f32.mrb[11].mxu0  ;;  %3108 = vmatmul.mubr.msk.f32.vlgmr.msra.gmra.mrb[16].mxu1 %vm580_vm4, %v1460_v19 }
 0xc3e   :  { %3116 = vmatpush3.msra.mxu1 %v3561_v51  ;;  %3117 = vmatprep.mubr.msk.f32.mxu1 %vm3357_vm3, %v3356_v31 }
 0xc3f   :  { %3125 = vmatprep.subr.mxu1 %v3356_v31 }
 0xc40   :  { %v1664_v21 = vpop.f32.mrb[12].mxu0 }
 0xc41   :  { %v1668_v24 = vmul.f32 0.35355338, %v1664_v21  ;;  %v3114_v27 = vpop.f32.mrb[13].mxu0 }
 0xc43   :  { %v1669_v6 = vsel %vm580_vm4, %v1668_v24, -inf }
 0xc44   :  { %1670 = vmax.xlane.f32.xlu1 %v1669_v6  ;;  %v1827_v29 = vpop.f32.mrb[14].mxu0 }
 0xc45   :  { %v1831_v30 = vmul.f32 0.35355338, %v1827_v29  ;;  %v3124_v28 = vpop.f32.mrb[15].mxu0 }
 0xc47   :  { %v1832_v32 = vsel %vm580_vm4, %v1831_v30, -inf }
 0xc48   :  { %1833 = vmax.xlane.f32.xlu0 %v1832_v32 }
 0xc5e   :  { %1844 = vrot.lane.b32.xlu0 %v3561_v51, %s3359_s18 }
 0xcd1   :  { %v1671_v33 = vpop.xlane.xlu1 %1670 }
 0xcd2   :  { %v1672_v35 = vsub.f32 %v1668_v24, %v1671_v33 }
 0xcd4   :  { %v1673_v23 = vmul.f32 1.442695, %v1672_v35 }
 0xcd5   :  { %v1834_v37 = vpop.xlane.xlu0 %1833 }
 0xcd6   :  { %3294 = vpow2.f32 %v1673_v23  ;;  %v1835_v25 = vsub.f32 %v1831_v30, %v1834_v37 }
 0xcd8   :  { %v1836_v39 = vmul.f32 1.442695, %v1835_v25 }
 0xcd9   :  { %v1845_v54 = vpop.permute.xlu0 %1844 }
 0xcda   :  { %3296 = vpow2.f32 %v1836_v39 }
 0xce0   :  { %v3295_v40 = vpop.eup %3294 }
 0xce1   :  { %v1675_v41 = vsel %vm580_vm4, %v3295_v40, 0.0 }
 0xce2   :  { %1676 = vadd.xlane.f32.xlu1 %v1675_v41 }
 0xce4   :  { %v3297_v42 = vpop.eup %3296 }
 0xce5   :  { %v1838_v43 = vsel %vm580_vm4, %v3297_v42, 0.0 }
 0xce6   :  { %1839 = vadd.xlane.f32.xlu1 %v1838_v43 }
 0xcf7   :  { %2068 = vrot.lane.b32.xlu1 %v3665_v63, %s3358_s28 }
 0xcfb   :  { %2066 = vrot.lane.b32.xlu1 %v3671_v3, %s3358_s28 }
 0xd10   :  { %v1534_v44 = vpop.f32.mrb[16].mxu1 }
 0xd11   :  { %v3719_v45 = vadd.f32 %v1534_v44, %v1297_v11  ;;  %v3109_v47 = vpop.f32.mrb[17].mxu1  ;;  %v2905_v44 = vld [vmem:[%s3861_s5 + $0x7] ss:$0 sm:$0xff] }
 0xd6f   :  { %v1677_v48 = vpop.xlane.xlu1 %1676 }
 0xd70   :  { %3298 = vrcp.f32 %v1677_v48 }
 0xd73   :  { %v1840_v49 = vpop.xlane.xlu1 %1839 }
 0xd74   :  { %3300 = vrcp.f32 %v1840_v49 }
 0xd77   :  { %v2069_v59 = vpop.permute.xlu1 %2068 }
 0xd7a   :  { %v3299_v50 = vpop.eup %3298 }
 0xd7b   :  { %v1679_v53 = vmul.f32 %v3299_v50, %v3295_v40 }
 0xd7d   :  { %3118 = vmatmul.mubr.msk.f32.vlgmr.msra.gmra.mrb[18].mxu1 %vm580_vm4, %v1679_v53 }
 0xd7e   :  { %v3301_v55 = vpop.eup %3300  ;;  %3126 = vmatpush3.msra.mxu1 %v1845_v54  ;;  %3127 = vmatprep.mubr.msk.f32.mxu1 %vm3357_vm3, %v3356_v31 }
 0xd7f   :  { %v1842_v56 = vmul.f32 %v3301_v55, %v3297_v42  ;;  %3135 = vmatprep.subr.mxu1 %v3356_v31 }
 0xd81   :  { %3128 = vmatmul.mubr.msk.f32.vlgmr.msra.gmra.mrb[20].mxu1 %vm580_vm4, %v1842_v56 }
 0xd82   :  { %3136 = vmatpush3.msra.mxu1 %v3594_v10  ;;  %3137 = vmatprep.mubr.msk.f32.mxu1 %vm3357_vm3, %v3356_v31  ;;  %v2067_v10 = vpop.permute.xlu1 %2066 }
 0xd83   :  { %3145 = vmatprep.subr.mxu1 %v3356_v31 }
 0xe50   :  { %v1749_v57 = vpop.f32.mrb[18].mxu1 }
 0xe51   :  { %v3119_v58 = vpop.f32.mrb[19].mxu1  ;;  %3138 = vmatmul.mubr.msk.f32.vlgmr.msra.gmra.mrb[22].mxu1 %vm580_vm4, %v1749_v57 }
 0xe52   :  { %3147 = vmatprep.mubr.msk.f32.mxu1 %vm3357_vm3, %v3356_v31 }
 0xe54   :  { %v1916_v60 = vpop.f32.mrb[20].mxu1 }
 0xe55   :  { %v3129_v61 = vpop.f32.mrb[21].mxu1  ;;  %3133 = vmatmul.mubr.msk.f32.vlgmr.msra.gmra.mrb[16].mxu0 %vm580_vm4, %v1916_v60  ;;  %v41_v60 = vld [vmem:[%s3860_s4 + $0x88] sm:$0xff] }
 0xe56   :  { %3141 = vmatpush3.xpose.msk.msra.mxu0 %vm580_vm4, %v2069_v59  ;;  %3142 = vmatprep.mubr.msk.f32.mxu0 %vm3357_vm3, %v3356_v31  ;;  %v40_v59 = vld [vmem:[%s3860_s4 + $0x80] sm:$0xff] }
 0xe57   :  { %3150 = vmatprep.subr.mxu0 %v3356_v31  ;;  %v44_v61 = vld [vmem:[%s3860_s4 + $0xa0] sm:$0xff] }
 0xe59   :  { %3143 = vmatmul.mubr.msk.f32.vlgmr.msra.gmra.mrb[18].mxu0 %vm580_vm4, %v2067_v10  ;;  %v3227_v10 = vpack.c.bf16 %v41_v60, %v40_v59 }
 0xe5a   :  { %3151 = vmatpush3.msra.mxu0 %v3644_v46  ;;  %3152 = vmatprep.mubr.msk.f32.mxu0 %vm3357_vm3, %v3356_v31 }
 0xe5b   :  { %3160 = vmatprep.subr.mxu0 %v3356_v31 }
 0xf24   :  { %v2062_v12 = vpop.f32.mrb[22].mxu1 }
 0xf25   :  { %v3139_v62 = vpop.f32.mrb[23].mxu1 }
 0xf26   :  { %v42_v62 = vld [vmem:[%s3860_s4 + $0x90] sm:$0xff] }
 0xf28   :  { %v1989_v34 = vpop.f32.mrb[16].mxu0 }
 0xf29   :  { %v2063_v0 = vadd.f32 %v2062_v12, %v1989_v34  ;;  %v3134_v1 = vpop.f32.mrb[17].mxu0  ;;  %v43_v34 = vld [vmem:[%s3860_s4 + $0x98] sm:$0xff] }
 0xf2a   :  { %v3231_v1 = vpack.c.bf16 %v43_v34, %v42_v62 }
 0xf2c   :  { %v2140_v2 = vpop.f32.mrb[18].mxu0 }
 0xf2d   :  { %v2144_v22 = vmul.f32 0.35355338, %v2140_v2  ;;  %v3144_v4 = vpop.f32.mrb[19].mxu0  ;;  %v47_v2 = vld [vmem:[%s3860_s4 + $0xb8] sm:$0xff] }
 0xf2f   :  { %v2145_v7 = vsel %vm580_vm4, %v2144_v22, -inf }
 0xf30   :  { %2146 = vmax.xlane.f32.xlu0 %v2145_v7 }
 0xf46   :  { %2156 = vrot.lane.b32.xlu0 %v3561_v51, %s3358_s28 }
 0xf4a   :  { %2306 = vrot.lane.b32.xlu0 %v3671_v3, %s3360_s24 }
 0xfbd   :  { %v2147_v46 = vpop.xlane.xlu0 %2146 }
 0xfbe   :  { %v2148_v8 = vsub.f32 %v2144_v22, %v2147_v46 }
 0xfc0   :  { %v2149_v9 = vmul.f32 1.442695, %v2148_v8 }
 0xfc1   :  { %v2157_v26 = vpop.permute.xlu0 %2156 }
 0xfc2   :  { %3302 = vpow2.f32 %v2149_v9  ;;  %3146 = vmatpush3.msra.mxu1 %v2157_v26 }
 0xfc3   :  { %3155 = vmatprep.subr.mxu1 %v3356_v31 }
 0xfc5   :  { %v2307_v16 = vpop.permute.xlu0 %2306 }
 0xfcc   :  { %v3303_v52 = vpop.eup %3302 }
 0xfcd   :  { %v2151_v11 = vsel %vm580_vm4, %v3303_v52, 0.0 }
 0xfce   :  { %2152 = vadd.xlane.f32.xlu1 %v2151_v11  ;;  %v49_v11 = vld [vmem:[%s3860_s4 + $0xc8] sm:$0xff] }
 0xfdf   :  { %2308 = vrot.lane.b32.xlu1 %v3665_v63, %s3360_s24  ;;  %v2904_v63 = vld [vmem:[%s3861_s5 + $0x3] ss:$0 sm:$0xff] }
 0xfe0   :  { %v1543_v17 = vadd.f32 %v2904_v63, %v3719_v45 }
 0xfe2   :  { %v1544_v20 = vadd.f32 %v1543_v17, %v3538_v36 }
 0xfe4   :  { %v1545_v6 = vmul.f32 %v1544_v20, %v1544_v20 }
 0xfe6   :  { %v1546_v29 = vsel %vm65_vm0, %v1545_v6, 0.0 }
0x105b   :  { %v2153_v13 = vpop.xlane.xlu1 %2152 }
0x105c   :  { %3304 = vrcp.f32 %v2153_v13 }
0x105f   :  { %v2309_v3 = vpop.permute.xlu1 %2308 }
0x1066   :  { %v3305_v14 = vpop.eup %3304 }
0x1067   :  { %v2155_v15 = vmul.f32 %v3305_v14, %v3303_v52  ;;  %v48_v52 = vld [vmem:[%s3860_s4 + $0xc0] sm:$0xff]  ;;  %v50_v14 = vld [vmem:[%s3860_s4 + $0xd0] sm:$0xff] }
0x1068   :  { %v3243_v13 = vpack.c.bf16 %v49_v11, %v48_v52 }
0x1069   :  { %3148 = vmatmul.mubr.msk.f32.vlgmr.msra.gmra.mrb[24].mxu1 %vm580_vm4, %v2155_v15  ;;  %v51_v15 = vld [vmem:[%s3860_s4 + $0xd8] sm:$0xff] }
0x106a   :  { %3156 = vmatpush3.xpose.msk.msra.mxu1 %vm580_vm4, %v2309_v3  ;;  %3157 = vmatprep.mubr.msk.f32.mxu1 %vm3357_vm3, %v3356_v31  ;;  %v3247_v3 = vpack.c.bf16 %v51_v15, %v50_v14 }
0x106b   :  { %3165 = vmatprep.subr.mxu1 %v3356_v31 }
0x106d   :  { %3158 = vmatmul.mubr.msk.f32.vlgmr.msra.gmra.mrb[26].mxu1 %vm580_vm4, %v2307_v16  ;;  %v2923_v16 = vld [vmem:[%s3861_s5 + $0x4] ss:$0 sm:$0xff] }
0x106e   :  { %3166 = vmatpush3.msra.mxu1 %v3682_v5  ;;  %3167 = vmatprep.mubr.msk.f32.mxu1 %vm3357_vm3, %v3356_v31 }
0x113c   :  { %v2228_v18 = vpop.f32.mrb[24].mxu1 }
0x113d   :  { %v3149_v19 = vpop.f32.mrb[25].mxu1  ;;  %3153 = vmatmul.mubr.msk.f32.vlgmr.msra.gmra.mrb[20].mxu0 %vm580_vm4, %v2228_v18 }
0x113e   :  { %3162 = vmatprep.mubr.msk.f32.mxu0 %vm3357_vm3, %v3356_v31 }
0x1140   :  { %v2380_v21 = vpop.f32.mrb[26].mxu1 }
0x1141   :  { %v2384_v5 = vmul.f32 0.35355338, %v2380_v21  ;;  %v3159_v24 = vpop.f32.mrb[27].mxu1 }
0x1143   :  { %v2385_v27 = vsel %vm580_vm4, %v2384_v5, -inf }
0x1144   :  { %2386 = vmax.xlane.f32.xlu1 %v2385_v27 }
0x1148   :  { %1547 = vadd.xlane.f32.xlu1 %v1546_v29 }
0x11d1   :  { %v2387_v30 = vpop.xlane.xlu1 %2386 }
0x11d2   :  { %v2388_v28 = vsub.f32 %v2384_v5, %v2387_v30 }
0x11d4   :  { %v2389_v32 = vmul.f32 1.442695, %v2388_v28 }
0x11d5   :  { %v1548_v37 = vpop.xlane.xlu1 %1547 }
0x11d6   :  { %3306 = vpow2.f32 %v2389_v32  ;;  %v1550_v25 = vmul.f32 0.03125, %v1548_v37  ;;  %v2926_v37 = vld [vmem:[%s3861_s5 + $0x5] ss:$0 sm:$0xff] }
0x11d8   :  { %v1551_v39 = vadd.f32 1.1920929e-07, %v1550_v25 }
0x11da   :  { %3308 = vrsqrt.f32 %v1551_v39 }
0x11e0   :  { %v3307_v33 = vpop.eup %3306 }
0x11e1   :  { %v2391_v35 = vsel %vm580_vm4, %v3307_v33, 0.0 }
0x11e2   :  { %2392 = vadd.xlane.f32.xlu0 %v2391_v35 }
0x11e4   :  { %v3309_v42 = vpop.eup %3308 }
0x11e5   :  { %v1553_v43 = vmul.f32 %v3309_v42, %v1544_v20 }
0x11f8   :  { %2396 = vrot.lane.b32.xlu0 %v3561_v51, %s3360_s24  ;;  %v3777_v51 = vmul.f32 %v2905_v44, %v1553_v43 }
0x1210   :  { %v2301_v31 = vpop.f32.mrb[20].mxu0 }
0x1211   :  { %v2305_v36 = vadd.f32 %v2301_v31, %v2063_v0  ;;  %v3154_v23 = vpop.f32.mrb[21].mxu0  ;;  %v46_v0 = vld [vmem:[%s3860_s4 + $0xb0] sm:$0xff] }
0x1212   :  { %v3239_v22 = vpack.c.bf16 %v47_v2, %v46_v0 }
0x126f   :  { %v2393_v40 = vpop.xlane.xlu0 %2392 }
0x1270   :  { %3310 = vrcp.f32 %v2393_v40 }
0x1273   :  { %v2397_v41 = vpop.permute.xlu0 %2396 }
0x1274   :  { %3161 = vmatpush3.msra.mxu0 %v2397_v41 }
0x1275   :  { %3228 = vmatprep.subr.bf16.mxu0 %v3227_v10 }
0x127a   :  { %v3311_v45 = vpop.eup %3310 }
0x127b   :  { %v2395_v47 = vmul.f32 %v3311_v45, %v3307_v33 }
0x127d   :  { %3163 = vmatmul.mubr.msk.f32.vlgmr.msra.gmra.mrb[22].mxu0 %vm580_vm4, %v2395_v47 }
0x127e   :  { %3178 = vmatprep.mubr.msk.f32.mxu0 %vm65_vm0, %v3777_v51  ;;  %3230 = vmatpush3.bf16.msra.mxu0 %v3227_v10 }
0x127f   :  { %3232 = vmatprep.subr.bf16.mxu0 %v3231_v1 }
0x1282   :  { %3234 = vmatpush3.bf16.msra.mxu0 %v3231_v1 }
0x1283   :  { %3244 = vmatprep.subr.bf16.mxu0 %v3243_v13 }
0x1350   :  { %v2468_v48 = vpop.f32.mrb[22].mxu0 }
0x1351   :  { %v3164_v49 = vpop.f32.mrb[23].mxu0  ;;  %3168 = vmatmul.mubr.msk.f32.vlgmr.msra.gmra.mrb[28].mxu1 %vm580_vm4, %v2468_v48  ;;  %v2929_v48 = vld [vmem:[%s3861_s5 + $0x6] ss:$0 sm:$0xff] }
0x1352   :  { %3189 = vmatprep.mubr.msk.f32.mxu1 %vm65_vm0, %v3777_v51 }
0x1424   :  { %v2541_v50 = vpop.f32.mrb[28].mxu1 }
0x1425   :  { %v2545_v53 = vadd.f32 %v2541_v50, %v2305_v36  ;;  %v3169_v54 = vpop.f32.mrb[29].mxu1 }
0x1427   :  { %v2546_v55 = vadd.f32 %v2904_v63, %v2545_v53 }
0x1429   :  { %v2547_v56 = vadd.f32 %v2546_v55, %v3545_v38  ;;  %v45_v38 = vld [vmem:[%s3860_s4 + $0xa8] sm:$0xff] }
0x142a   :  { %v3235_v12 = vpack.c.bf16 %v45_v38, %v44_v61 }
0x142b   :  { %v2548_v57 = vmul.f32 %v2547_v56, %v2547_v56 }
0x142c   :  { %3236 = vmatprep.subr.bf16.mxu1 %v3235_v12 }
0x142d   :  { %v2549_v58 = vsel %vm65_vm0, %v2548_v57, 0.0  ;;  %3238 = vmatpush3.bf16.msra.mxu1 %v3235_v12 }
0x142e   :  { %2550 = vadd.xlane.f32.xlu1 %v2549_v58  ;;  %3240 = vmatprep.subr.bf16.mxu1 %v3239_v22 }
0x1431   :  { %3242 = vmatpush3.bf16.msra.mxu1 %v3239_v22 }
0x14bb   :  { %v2551_v4 = vpop.xlane.xlu1 %2550 }
0x14bc   :  { %v2552_v7 = vmul.f32 0.03125, %v2551_v4 }
0x14be   :  { %v2553_v46 = vadd.f32 1.1920929e-07, %v2552_v7 }
0x14c0   :  { %3312 = vrsqrt.f32 %v2553_v46 }
0x14ca   :  { %v3313_v8 = vpop.eup %3312 }
0x14cb   :  { %v2555_v9 = vmul.f32 %v3313_v8, %v2547_v56 }
0x14cd   :  { %v2556_v26 = vmul.f32 %v2905_v44, %v2555_v9 }
0x14cf   :  { %3179 = vmatmul.mubr.msk.f32.vlgmr.msra.gmra.mrb[24].mxu0 %vm65_vm0, %v2556_v26  ;;  %3190 = vmatmul.mubr.msk.f32.vlgmr.msra.gmra.mrb[30].mxu1 %vm65_vm0, %v2556_v26 }
0x14d0   :  { %3246 = vmatpush3.bf16.msra.mxu0 %v3243_v13 }
0x14d1   :  { %3248 = vmatprep.subr.bf16.mxu0 %v3247_v3 }
0x14d4   :  { %3250 = vmatpush3.bf16.msra.mxu0 %v3247_v3 }
0x15a2   :  { %v3180_v63 = vpop.f32.mrb[24].mxu0  ;;  %v3191_v17 = vpop.f32.mrb[30].mxu1 }
0x15a3   :  { %v2639_v18 = vadd.f32 %v3180_v63, %v2923_v16  ;;  %v2633_v19 = vpop.f32.mrb[25].mxu0  ;;  %v2730_v20 = vpop.f32.mrb[31].mxu1  ;;  %v2736_v42 = vadd.f32 %v3191_v17, %v2926_v37 }
0x15a4   :  { %v2634_v21 = vadd.f32 %v2923_v16, %v2633_v19  ;;  %v2731_v44 = vadd.f32 %v2926_v37, %v2730_v20 }
0x15a5   :  { %v2643_v5 = vmul.f32 %v2639_v18, %v2639_v18 }
0x15a6   :  { %v2642_v24 = vmul.f32 %v2634_v21, %v2634_v21 }
0x15a7   :  { %v2645_v27 = vmul.f32 %v2643_v5, %v2639_v18 }
0x15a8   :  { %v2644_v6 = vmul.f32 %v2642_v24, %v2634_v21 }
0x15a9   :  { %v2647_v29 = vmul.f32 0.044715, %v2645_v27 }
0x15aa   :  { %v2646_v30 = vmul.f32 0.044715, %v2644_v6 }
0x15ab   :  { %v2649_v28 = vadd.f32 %v2647_v29, %v2639_v18 }
0x15ac   :  { %v2648_v32 = vadd.f32 %v2646_v30, %v2634_v21 }
0x15ad   :  { %v2651_v33 = vmul.f32 0.7978846, %v2649_v28 }
0x15ae   :  { %v2650_v35 = vmul.f32 0.7978846, %v2648_v32 }
0x15af   :  { %3314 = vtanh.f32 %v2651_v33 }
0x15b0   :  { %3316 = vtanh.f32 %v2650_v35 }
0x15b9   :  { %v3315_v31 = vpop.eup %3314 }
0x15ba   :  { %v3317_v36 = vpop.eup %3316  ;;  %v2655_v23 = vadd.f32 1.0, %v3315_v31 }
0x15bb   :  { %v2654_v25 = vadd.f32 1.0, %v3317_v36 }
0x15bc   :  { %v2657_v39 = vmul.f32 0.5, %v2655_v23 }
0x15bd   :  { %v2656_v40 = vmul.f32 0.5, %v2654_v25 }
0x15be   :  { %v2659_v41 = vmul.f32 %v2657_v39, %v2639_v18 }
0x15bf   :  { %v2658_v43 = vmul.f32 %v2656_v40, %v2634_v21 }
0x15c0   :  { %v2740_v45 = vmul.f32 %v2736_v42, %v2659_v41 }
0x15c1   :  { %v2739_v47 = vmul.f32 %v2731_v44, %v2658_v43 }
0x15c3   :  { %3200 = vmatprep.mubr.msk.f32.mxu0 %vm65_vm0, %v2739_v47 }
0x15c4   :  { %3201 = vmatmul.mubr.msk.f32.vlgmr.msra.gmra.mrb[26].mxu0 %vm65_vm0, %v2740_v45 }
0x1697   :  { %v3202_v49 = vpop.f32.mrb[26].mxu0 }
0x1698   :  { %v2823_v50 = vadd.f32 %v3202_v49, %v2929_v48  ;;  %v2817_v53 = vpop.f32.mrb[27].mxu0 }
0x1699   :  { %v2818_v54 = vadd.f32 %v2929_v48, %v2817_v53 }
0x169a   :  { %v2827_v55 = vadd.f32 %v2823_v50, %v2556_v26 }
0x169b   :  { %v2826_v56 = vadd.f32 %v2818_v54, %v3777_v51  ;;  %v2932_v51 = vld [vmem:[%s3861_s5 + $0x8] ss:$0 sm:$0xff] }
0x169c   :  { %v2829_v59 = vmul.f32 %v2827_v55, %v2827_v55 }
0x169d   :  { %v2828_v57 = vmul.f32 %v2826_v56, %v2826_v56 }
0x169e   :  { %v2833_v60 = vsel %vm65_vm0, %v2829_v59, 0.0 }
0x169f   :  { %v2830_v58 = vsel %vm65_vm0, %v2828_v57, 0.0 }
0x16a0   :  { %2831 = vadd.xlane.f32.xlu1 %v2830_v58 }
0x16a4   :  { %2834 = vadd.xlane.f32.xlu1 %v2833_v60 }
0x172d   :  { %v2832_v61 = vpop.xlane.xlu1 %2831 }
0x172e   :  { %v2836_v10 = vmul.f32 0.03125, %v2832_v61 }
0x1730   :  { %v2838_v38 = vadd.f32 1.1920929e-07, %v2836_v10 }
0x1731   :  { %v2835_v12 = vpop.xlane.xlu1 %2834 }
0x1732   :  { %3318 = vrsqrt.f32 %v2838_v38  ;;  %v2837_v62 = vmul.f32 0.03125, %v2835_v12 }
0x1734   :  { %v2839_v34 = vadd.f32 1.1920929e-07, %v2837_v62 }
0x1736   :  { %3320 = vrsqrt.f32 %v2839_v34 }
0x173c   :  { %v3319_v0 = vpop.eup %3318 }
0x173d   :  { %v2842_v1 = vmul.f32 %v3319_v0, %v2826_v56 }
0x173f   :  { %v2848_v2 = vmul.f32 %v2932_v51, %v2842_v1 }
0x1740   :  { %v3321_v22 = vpop.eup %3320 }
0x1741   :  { %v2843_v4 = vmul.f32 %v3321_v22, %v2827_v55  ;;  %2850 = vst.msk [vmem:[#allocation2] sm:$0xff] %vm65_vm0, %v2848_v2 }
0x1743   :  { %v2849_v7 = vmul.f32 %v2932_v51, %v2843_v4 }
0x1745   :  { %2851 = vst.msk [vmem:[#allocation2 + $0x8] sm:$0xff] %vm65_vm0, %v2849_v7 }
0x1746   :  { %3333 = shalt.err (!%p3330_p4)
}
0x1747   :  { %s3334_s15 = scalar_lea.hbm %s3862_s6, 256 }
0x1748   :  { %p3335_p5 = scmp.ne.s32.totalorder %s3862_s6, %s3334_s15  ;;  %p3338_p6 = scmp.lt.u32.totalorder %s3334_s15, %s3862_s6 }
0x174a   :  { %p3340_p7 = pnand %p3338_p6, %p3335_p5 }
0x174c   :  { %3343 = shalt.err (!%p3340_p7)
}
0x174d   :  { %s3362_s19 = smov 128   ;;  %s3363_s20 = smov 8  }
0x174e   :  { %2863 = dma.vmem_to_hbm [thread:$0]  %s2858_s12, 256, %s3862_s6, [#allocation3], %s3362_s19, %s3362_s19, %s3363_s20  }
0x174f   :  { %3344 = dma.done.wait [#allocation3], 256  }
0x1750   :  { %3345 = vsyncadd [#allocation3], 4294967040 }
0x1751   :  { %2867 = vsyncpa [#allocation3], 1 }

</bundles_post_ra>
